<compile_context>
chip_gen: v5e
topology: v5e:2x2
jax: 0.10.0
libtpu: 0.0.40
codegen_flags: <defaults>
</compile_context>

<pallas_src>
import functools

import jax
import jax.numpy as jnp
from jax import lax
from jax.experimental import pallas as pl
from jax.experimental.pallas import tpu as pltpu
import numpy as np

# Fixed LeNet geometry (input must be 1x32x32 so that fc1 sees 16*5*5 = 400).
K = 5
H_IN = W_IN = 32
C1_IN, C1_OUT = 1, 6
HP1 = WP1 = 14            # pooled conv1 spatial size
C2_IN, C2_OUT = 6, 16
HP2 = WP2 = 5             # pooled conv2 spatial size


# ----------------------------------------------------------------------------
# Fused Pallas kernel: one image per grid step, everything stays in VMEM.
# ----------------------------------------------------------------------------
def _lenet_kernel(x_ref, s1_ref, b1_ref, s2_ref, b2_ref,
                  w1_ref, fb1_ref, w2_ref, fb2_ref, w3_ref, fb3_ref,
                  o_ref, y1p_ref):
    # ---- stage 1: conv1 (5x5, 1->6) + bias + ReLU + 2x2 maxpool, fused -----
    # pooled output layout: (HP1, WP1*C1_OUT) = (14, 84), i.e. [h, w*C + c]
    best1 = None
    for dh in range(2):                      # pool tap, H direction
        for dw in range(2):                  # pool tap, W direction (in S1)
            acc = None
            for kh in range(K):
                # rows dh+kh, dh+kh+2, ... -> output rows 2*hp+dh of the conv
                xs = x_ref[pl.ds(dh + kh, HP1, stride=2), :]        # (14, 32)
                t = jnp.dot(xs, s1_ref[dw, kh],
                            preferred_element_type=jnp.float32)     # (14, 84)
                acc = t if acc is None else acc + t
            best1 = acc if best1 is None else jnp.maximum(best1, acc)
    y1p_ref[...] = jnp.maximum(best1 + b1_ref[...], 0.0)            # (14, 84)

    # ---- stage 2: conv2 (5x5, 6->16) + bias + ReLU + 2x2 maxpool, fused ----
    # pooled output layout: (HP2, WP2*C2_OUT) = (5, 80)
    best2 = None
    for dh in range(2):
        for dw in range(2):
            acc = None
            for kh in range(K):
                ys = y1p_ref[pl.ds(dh + kh, HP2, stride=2), :]      # (5, 84)
                t = jnp.dot(ys, s2_ref[dw, kh],
                            preferred_element_type=jnp.float32)     # (5, 80)
                acc = t if acc is None else acc + t
            best2 = acc if best2 is None else jnp.maximum(best2, acc)
    y2p = jnp.maximum(best2 + b2_ref[...], 0.0)                     # (5, 80)

    # ---- MLP head: fc1+ReLU, fc2+ReLU, fc3+ReLU -----------------------------
    # torch's NCHW flatten permutation is baked into w1_ref (see pack_params),
    # so fc1 is the sum over the 5 pooled rows of (1,80)@(80,120) matmuls and
    # no activation transpose/reshape is needed.
    h = fb1_ref[...]                                                # (1, 120)
    for hp in range(HP2):
        h = h + jnp.dot(y2p[hp:hp + 1, :], w1_ref[hp],
                        preferred_element_type=jnp.float32)
    h = jnp.maximum(h, 0.0)
    h = jnp.maximum(jnp.dot(h, w2_ref[...],
                            preferred_element_type=jnp.float32) + fb2_ref[...],
                    0.0)
    # NOTE: the reference PyTorch module applies ReLU after fc3 as well.
    h = jnp.maximum(jnp.dot(h, w3_ref[...],
                            preferred_element_type=jnp.float32) + fb3_ref[...],
                    0.0)
    o_ref[...] = h.astype(o_ref.dtype)


# ----------------------------------------------------------------------------
# One-time parameter packing (hoisted out of the forward pass).
# ----------------------------------------------------------------------------
def pack_params(params):
    """Build banded block-Toeplitz conv matrices, tiled biases, and permuted
    fc weights, once.  Conv weights are torch-layout (Cout, Cin, Kh, Kw)."""
    w1 = np.asarray(params["conv1_w"], np.float32)    # (6, 1, 5, 5)
    b1 = np.asarray(params["conv1_b"], np.float32)    # (6,)
    w2 = np.asarray(params["conv2_w"], np.float32)    # (16, 6, 5, 5)
    b2 = np.asarray(params["conv2_b"], np.float32)    # (16,)
    fw1 = np.asarray(params["fc1_w"], np.float32)     # (120, 400)
    fw2 = np.asarray(params["fc2_w"], np.float32)     # (84, 120)
    fw3 = np.asarray(params["fc3_w"], np.float32)     # (num_class, 84)

    # conv1: S1[dw, kh, wv*Cin+ci, wp*Cout+co] = w1[co, ci, kh, wv-(2wp+dw)]
    s1 = np.zeros((2, K, W_IN * C1_IN, WP1 * C1_OUT), np.float32)
    for dw in range(2):
        for kh in range(K):
            for wp in range(WP1):
                for kw in range(K):
                    wv = 2 * wp + dw + kw
                    s1[dw, kh, wv, wp * C1_OUT:(wp + 1) * C1_OUT] = w1[:, 0, kh, kw]

    # conv2: same construction, Cin=6, input fused width = WP1*C2_IN = 84.
    s2 = np.zeros((2, K, WP1 * C2_IN, WP2 * C2_OUT), np.float32)
    for dw in range(2):
        for kh in range(K):
            for wp in range(WP2):
                for kw in range(K):
                    wv = 2 * wp + dw + kw
                    for ci in range(C2_IN):
                        s2[dw, kh, wv * C2_IN + ci,
                           wp * C2_OUT:(wp + 1) * C2_OUT] = w2[:, ci, kh, kw]

    # fc1 with torch's NCHW flatten (index = c*25 + h*5 + w) baked into rows;
    # kernel-side activation layout is [h, w*C + c].
    fc1_out = fw1.shape[0]
    w1p = np.zeros((HP2, WP2 * C2_OUT, fc1_out), np.float32)
    for hp in range(HP2):
        for wp in range(WP2):
            for co in range(C2_OUT):
                w1p[hp, wp * C2_OUT + co, :] = fw1[:, co * 25 + hp * 5 + wp]

    return dict(
        s1=jnp.asarray(s1),
        b1=jnp.asarray(np.tile(b1, WP1).reshape(1, WP1 * C1_OUT)),
        s2=jnp.asarray(s2),
        b2=jnp.asarray(np.tile(b2, WP2).reshape(1, WP2 * C2_OUT)),
        w1=jnp.asarray(w1p),
        fb1=jnp.asarray(np.asarray(params["fc1_b"], np.float32).reshape(1, -1)),
        w2=jnp.asarray(np.ascontiguousarray(fw2.T)),
        fb2=jnp.asarray(np.asarray(params["fc2_b"], np.float32).reshape(1, -1)),
        w3=jnp.asarray(np.ascontiguousarray(fw3.T)),
        fb3=jnp.asarray(np.asarray(params["fc3_b"], np.float32).reshape(1, -1)),
    )


def init_params(key, num_class=10):
    ks = jax.random.split(key, 10)

    def u(k, shape, fan_in):
        bound = 1.0 / np.sqrt(fan_in)
        return jax.random.uniform(k, shape, jnp.float32, -bound, bound)

    return dict(
        conv1_w=u(ks[0], (6, 1, 5, 5), 1 * 25),
        conv1_b=u(ks[1], (6,), 1 * 25),
        conv2_w=u(ks[2], (16, 6, 5, 5), 6 * 25),
        conv2_b=u(ks[3], (16,), 6 * 25),
        fc1_w=u(ks[4], (120, 400), 400),
        fc1_b=u(ks[5], (120,), 400),
        fc2_w=u(ks[6], (84, 120), 120),
        fc2_b=u(ks[7], (84,), 120),
        fc3_w=u(ks[8], (num_class, 84), 84),
        fc3_b=u(ks[9], (num_class,), 84),
    )


# ----------------------------------------------------------------------------
# Forward pass: a single pallas_call, grid over the batch.
# ----------------------------------------------------------------------------
@jax.jit
def lenet_forward(x_nchw, packed):
    B = x_nchw.shape[0]
    assert x_nchw.shape[1:] == (1, H_IN, W_IN), x_nchw.shape
    num_class = packed["w3"].shape[1]
    x = x_nchw.reshape(B, H_IN, W_IN).astype(jnp.float32)   # squeeze Cin=1

    # Per-image FLOPs of the fused kernel (20 conv matmuls per stage + MLP).
    flops_per_img = (20 * 2 * HP1 * W_IN * (WP1 * C1_OUT)
                     + 20 * 2 * HP2 * (WP1 * C2_IN) * (WP2 * C2_OUT)
                     + HP2 * 2 * (WP2 * C2_OUT) * 120
                     + 2 * 120 * 84 + 2 * 84 * num_class)
    weight_bytes = sum(int(np.prod(v.shape)) * 4 for v in packed.values())
    cost = pl.CostEstimate(
        flops=int(flops_per_img) * B,
        transcendentals=0,
        bytes_accessed=int(B * H_IN * W_IN * 4 + weight_bytes
                           + B * num_class * 4),
    )

    const = lambda nd: (lambda b: (0,) * nd)   # weights: same block every step

    out = pl.pallas_call(
        _lenet_kernel,
        out_shape=jax.ShapeDtypeStruct((B, 1, num_class), jnp.float32),
        grid_spec=pltpu.PrefetchScalarGridSpec(
            num_scalar_prefetch=0,
            grid=(B,),
            in_specs=[
                pl.BlockSpec((None, H_IN, W_IN), lambda b: (b, 0, 0)),   # x
                pl.BlockSpec(packed["s1"].shape, const(4)),
                pl.BlockSpec(packed["b1"].shape, const(2)),
                pl.BlockSpec(packed["s2"].shape, const(4)),
                pl.BlockSpec(packed["b2"].shape, const(2)),
                pl.BlockSpec(packed["w1"].shape, const(3)),
                pl.BlockSpec(packed["fb1"].shape, const(2)),
                pl.BlockSpec(packed["w2"].shape, const(2)),
                pl.BlockSpec(packed["fb2"].shape, const(2)),
                pl.BlockSpec(packed["w3"].shape, const(2)),
                pl.BlockSpec(packed["fb3"].shape, const(2)),
            ],
            out_specs=pl.BlockSpec((None, 1, num_class), lambda b: (b, 0, 0)),
            scratch_shapes=[pltpu.VMEM((HP1, WP1 * C1_OUT), jnp.float32)],
        ),
        compiler_params=pltpu.CompilerParams(
            dimension_semantics=("parallel",),        # megacore on v7x
            vmem_limit_bytes=32 * 1024 * 1024,
        ),
        cost_estimate=cost,
    )(x, packed["s1"], packed["b1"], packed["s2"], packed["b2"],
      packed["w1"], packed["fb1"], packed["w2"], packed["fb2"],
      packed["w3"], packed["fb3"])
    return out.reshape(B, num_class)


# ----------------------------------------------------------------------------
# Pure-JAX (XLA) reference with identical semantics, for verification.
# ----------------------------------------------------------------------------
def lenet_reference(x_nchw, params):
    dn = ("NCHW", "OIHW", "NCHW")
    y = lax.conv_general_dilated(x_nchw, params["conv1_w"], (1, 1), "VALID",
                                 dimension_numbers=dn)
    y = jnp.maximum(y + params["conv1_b"][None, :, None, None], 0.0)
    y = lax.reduce_window(y, -jnp.inf, lax.max, (1, 1, 2, 2), (1, 1, 2, 2),
                          "VALID")
    y = lax.conv_general_dilated(y, params["conv2_w"], (1, 1), "VALID",
                                 dimension_numbers=dn)
    y = jnp.maximum(y + params["conv2_b"][None, :, None, None], 0.0)
    y = lax.reduce_window(y, -jnp.inf, lax.max, (1, 1, 2, 2), (1, 1, 2, 2),
                          "VALID")
    y = y.reshape(y.shape[0], -1)
    y = jnp.maximum(y @ params["fc1_w"].T + params["fc1_b"], 0.0)
    y = jnp.maximum(y @ params["fc2_w"].T + params["fc2_b"], 0.0)
    y = jnp.maximum(y @ params["fc3_w"].T + params["fc3_b"], 0.0)
    return y


if __name__ == "__main__":
    key = jax.random.PRNGKey(0)
    kx, kp = jax.random.split(key)
    # LeNet expects 32x32 single-channel input so that fc1 sees 16*5*5 = 400.
    x = jax.random.normal(kx, (2, 1, 32, 32), jnp.float32)       # NCHW
    params = init_params(kp, num_class=10)
    packed = pack_params(params)          # one-time packing, outside the jit

    out = lenet_forward(x, packed)
    out = jax.block_until_ready(out)
    ref = lenet_reference(x, params)

    assert out.shape == (2, 10), out.shape
    np.testing.assert_allclose(np.asarray(out), np.asarray(ref),
                               rtol=2e-2, atol=2e-2)
    print("KERNEL_OK")
</pallas_src>

<mosaic_0001>
module attributes {stable_mosaic.version = 11 : i64} {
  func.func @_lenet_kernel(%arg0: i32, %arg1: memref<1x32x32xf32, #tpu.memory_space<vmem>>, %arg2: memref<2x5x32x84xf32, #tpu.memory_space<vmem>>, %arg3: memref<1x84xf32, #tpu.memory_space<vmem>>, %arg4: memref<2x5x84x80xf32, #tpu.memory_space<vmem>>, %arg5: memref<1x80xf32, #tpu.memory_space<vmem>>, %arg6: memref<5x80x120xf32, #tpu.memory_space<vmem>>, %arg7: memref<1x120xf32, #tpu.memory_space<vmem>>, %arg8: memref<120x84xf32, #tpu.memory_space<vmem>>, %arg9: memref<1x84xf32, #tpu.memory_space<vmem>>, %arg10: memref<84x10xf32, #tpu.memory_space<vmem>>, %arg11: memref<1x10xf32, #tpu.memory_space<vmem>>, %arg12: memref<1x1x10xf32, #tpu.memory_space<vmem>>, %arg13: memref<14x84xf32, #tpu.memory_space<vmem>>) attributes {dimension_semantics = [#tpu.dimension_semantics<parallel>], iteration_bounds = array<i64: 2>, scalar_prefetch = 0 : i64, scratch_operands = 1 : i64, tpu.core_type = #tpu.core_type<tc>, window_params = [{transform_indices = @transform_0, window_bounds = array<i64: 1, 32, 32>}, {pipeline_mode = #tpu.pipeline_mode<synchronous>, transform_indices = @transform_1, window_bounds = array<i64: 2, 5, 32, 84>}, {pipeline_mode = #tpu.pipeline_mode<synchronous>, transform_indices = @transform_2, window_bounds = array<i64: 1, 84>}, {pipeline_mode = #tpu.pipeline_mode<synchronous>, transform_indices = @transform_3, window_bounds = array<i64: 2, 5, 84, 80>}, {pipeline_mode = #tpu.pipeline_mode<synchronous>, transform_indices = @transform_4, window_bounds = array<i64: 1, 80>}, {pipeline_mode = #tpu.pipeline_mode<synchronous>, transform_indices = @transform_5, window_bounds = array<i64: 5, 80, 120>}, {pipeline_mode = #tpu.pipeline_mode<synchronous>, transform_indices = @transform_6, window_bounds = array<i64: 1, 120>}, {pipeline_mode = #tpu.pipeline_mode<synchronous>, transform_indices = @transform_7, window_bounds = array<i64: 120, 84>}, {pipeline_mode = #tpu.pipeline_mode<synchronous>, transform_indices = @transform_8, window_bounds = array<i64: 1, 84>}, {pipeline_mode = #tpu.pipeline_mode<synchronous>, transform_indices = @transform_9, window_bounds = array<i64: 84, 10>}, {pipeline_mode = #tpu.pipeline_mode<synchronous>, transform_indices = @transform_10, window_bounds = array<i64: 1, 10>}, {transform_indices = @transform_11, window_bounds = array<i64: 1, 1, 10>}]} {
    %c0 = arith.constant 0 : index
    %c0_0 = arith.constant 0 : index
    %c0_1 = arith.constant 0 : index
    %0 = tpu.strided_load %arg1[%c0, %c0_0, %c0_1] {strides = array<i32: 1, 2, 1>} : memref<1x32x32xf32, #tpu.memory_space<vmem>>, vector<1x14x32xf32>
    %1 = vector.shape_cast %0 : vector<1x14x32xf32> to vector<14x32xf32>
    %c0_2 = arith.constant 0 : index
    %c0_3 = arith.constant 0 : index
    %c0_4 = arith.constant 0 : index
    %c0_5 = arith.constant 0 : index
    %2 = vector.load %arg2[%c0_2, %c0_3, %c0_4, %c0_5] : memref<2x5x32x84xf32, #tpu.memory_space<vmem>>, vector<1x1x32x84xf32>
    %3 = vector.shape_cast %2 : vector<1x1x32x84xf32> to vector<32x84xf32>
    %cst = arith.constant dense<0.000000e+00> : vector<14x84xf32>
    %4 = tpu.matmul %1, %3, %cst {dimension_numbers = #tpu.dot_dimension_numbers<[1], [0], [0], [1], [0, 0, 1, 1], [], []>} : vector<14x32xf32>, vector<32x84xf32>, vector<14x84xf32> -> vector<14x84xf32>
    %c0_6 = arith.constant 0 : index
    %c1 = arith.constant 1 : index
    %c0_7 = arith.constant 0 : index
    %5 = tpu.strided_load %arg1[%c0_6, %c1, %c0_7] {strides = array<i32: 1, 2, 1>} : memref<1x32x32xf32, #tpu.memory_space<vmem>>, vector<1x14x32xf32>
    %6 = vector.shape_cast %5 : vector<1x14x32xf32> to vector<14x32xf32>
    %c0_8 = arith.constant 0 : index
    %c1_9 = arith.constant 1 : index
    %c0_10 = arith.constant 0 : index
    %c0_11 = arith.constant 0 : index
    %7 = vector.load %arg2[%c0_8, %c1_9, %c0_10, %c0_11] : memref<2x5x32x84xf32, #tpu.memory_space<vmem>>, vector<1x1x32x84xf32>
    %8 = vector.shape_cast %7 : vector<1x1x32x84xf32> to vector<32x84xf32>
    %cst_12 = arith.constant dense<0.000000e+00> : vector<14x84xf32>
    %9 = tpu.matmul %6, %8, %cst_12 {dimension_numbers = #tpu.dot_dimension_numbers<[1], [0], [0], [1], [0, 0, 1, 1], [], []>} : vector<14x32xf32>, vector<32x84xf32>, vector<14x84xf32> -> vector<14x84xf32>
    %10 = arith.addf %4, %9 : vector<14x84xf32>
    %c0_13 = arith.constant 0 : index
    %c2 = arith.constant 2 : index
    %c0_14 = arith.constant 0 : index
    %11 = tpu.strided_load %arg1[%c0_13, %c2, %c0_14] {strides = array<i32: 1, 2, 1>} : memref<1x32x32xf32, #tpu.memory_space<vmem>>, vector<1x14x32xf32>
    %12 = vector.shape_cast %11 : vector<1x14x32xf32> to vector<14x32xf32>
    %c0_15 = arith.constant 0 : index
    %c2_16 = arith.constant 2 : index
    %c0_17 = arith.constant 0 : index
    %c0_18 = arith.constant 0 : index
    %13 = vector.load %arg2[%c0_15, %c2_16, %c0_17, %c0_18] : memref<2x5x32x84xf32, #tpu.memory_space<vmem>>, vector<1x1x32x84xf32>
    %14 = vector.shape_cast %13 : vector<1x1x32x84xf32> to vector<32x84xf32>
    %cst_19 = arith.constant dense<0.000000e+00> : vector<14x84xf32>
    %15 = tpu.matmul %12, %14, %cst_19 {dimension_numbers = #tpu.dot_dimension_numbers<[1], [0], [0], [1], [0, 0, 1, 1], [], []>} : vector<14x32xf32>, vector<32x84xf32>, vector<14x84xf32> -> vector<14x84xf32>
    %16 = arith.addf %10, %15 : vector<14x84xf32>
    %c0_20 = arith.constant 0 : index
    %c3 = arith.constant 3 : index
    %c0_21 = arith.constant 0 : index
    %17 = tpu.strided_load %arg1[%c0_20, %c3, %c0_21] {strides = array<i32: 1, 2, 1>} : memref<1x32x32xf32, #tpu.memory_space<vmem>>, vector<1x14x32xf32>
    %18 = vector.shape_cast %17 : vector<1x14x32xf32> to vector<14x32xf32>
    %c0_22 = arith.constant 0 : index
    %c3_23 = arith.constant 3 : index
    %c0_24 = arith.constant 0 : index
    %c0_25 = arith.constant 0 : index
    %19 = vector.load %arg2[%c0_22, %c3_23, %c0_24, %c0_25] : memref<2x5x32x84xf32, #tpu.memory_space<vmem>>, vector<1x1x32x84xf32>
    %20 = vector.shape_cast %19 : vector<1x1x32x84xf32> to vector<32x84xf32>
    %cst_26 = arith.constant dense<0.000000e+00> : vector<14x84xf32>
    %21 = tpu.matmul %18, %20, %cst_26 {dimension_numbers = #tpu.dot_dimension_numbers<[1], [0], [0], [1], [0, 0, 1, 1], [], []>} : vector<14x32xf32>, vector<32x84xf32>, vector<14x84xf32> -> vector<14x84xf32>
    %22 = arith.addf %16, %21 : vector<14x84xf32>
    %c0_27 = arith.constant 0 : index
    %c4 = arith.constant 4 : index
    %c0_28 = arith.constant 0 : index
    %23 = tpu.strided_load %arg1[%c0_27, %c4, %c0_28] {strides = array<i32: 1, 2, 1>} : memref<1x32x32xf32, #tpu.memory_space<vmem>>, vector<1x14x32xf32>
    %24 = vector.shape_cast %23 : vector<1x14x32xf32> to vector<14x32xf32>
    %c0_29 = arith.constant 0 : index
    %c4_30 = arith.constant 4 : index
    %c0_31 = arith.constant 0 : index
    %c0_32 = arith.constant 0 : index
    %25 = vector.load %arg2[%c0_29, %c4_30, %c0_31, %c0_32] : memref<2x5x32x84xf32, #tpu.memory_space<vmem>>, vector<1x1x32x84xf32>
    %26 = vector.shape_cast %25 : vector<1x1x32x84xf32> to vector<32x84xf32>
    %cst_33 = arith.constant dense<0.000000e+00> : vector<14x84xf32>
    %27 = tpu.matmul %24, %26, %cst_33 {dimension_numbers = #tpu.dot_dimension_numbers<[1], [0], [0], [1], [0, 0, 1, 1], [], []>} : vector<14x32xf32>, vector<32x84xf32>, vector<14x84xf32> -> vector<14x84xf32>
    %28 = arith.addf %22, %27 : vector<14x84xf32>
    %c0_34 = arith.constant 0 : index
    %c0_35 = arith.constant 0 : index
    %c0_36 = arith.constant 0 : index
    %29 = tpu.strided_load %arg1[%c0_34, %c0_35, %c0_36] {strides = array<i32: 1, 2, 1>} : memref<1x32x32xf32, #tpu.memory_space<vmem>>, vector<1x14x32xf32>
    %30 = vector.shape_cast %29 : vector<1x14x32xf32> to vector<14x32xf32>
    %c1_37 = arith.constant 1 : index
    %c0_38 = arith.constant 0 : index
    %c0_39 = arith.constant 0 : index
    %c0_40 = arith.constant 0 : index
    %31 = vector.load %arg2[%c1_37, %c0_38, %c0_39, %c0_40] : memref<2x5x32x84xf32, #tpu.memory_space<vmem>>, vector<1x1x32x84xf32>
    %32 = vector.shape_cast %31 : vector<1x1x32x84xf32> to vector<32x84xf32>
    %cst_41 = arith.constant dense<0.000000e+00> : vector<14x84xf32>
    %33 = tpu.matmul %30, %32, %cst_41 {dimension_numbers = #tpu.dot_dimension_numbers<[1], [0], [0], [1], [0, 0, 1, 1], [], []>} : vector<14x32xf32>, vector<32x84xf32>, vector<14x84xf32> -> vector<14x84xf32>
    %c0_42 = arith.constant 0 : index
    %c1_43 = arith.constant 1 : index
    %c0_44 = arith.constant 0 : index
    %34 = tpu.strided_load %arg1[%c0_42, %c1_43, %c0_44] {strides = array<i32: 1, 2, 1>} : memref<1x32x32xf32, #tpu.memory_space<vmem>>, vector<1x14x32xf32>
    %35 = vector.shape_cast %34 : vector<1x14x32xf32> to vector<14x32xf32>
    %c1_45 = arith.constant 1 : index
    %c1_46 = arith.constant 1 : index
    %c0_47 = arith.constant 0 : index
    %c0_48 = arith.constant 0 : index
    %36 = vector.load %arg2[%c1_45, %c1_46, %c0_47, %c0_48] : memref<2x5x32x84xf32, #tpu.memory_space<vmem>>, vector<1x1x32x84xf32>
    %37 = vector.shape_cast %36 : vector<1x1x32x84xf32> to vector<32x84xf32>
    %cst_49 = arith.constant dense<0.000000e+00> : vector<14x84xf32>
    %38 = tpu.matmul %35, %37, %cst_49 {dimension_numbers = #tpu.dot_dimension_numbers<[1], [0], [0], [1], [0, 0, 1, 1], [], []>} : vector<14x32xf32>, vector<32x84xf32>, vector<14x84xf32> -> vector<14x84xf32>
    %39 = arith.addf %33, %38 : vector<14x84xf32>
    %c0_50 = arith.constant 0 : index
    %c2_51 = arith.constant 2 : index
    %c0_52 = arith.constant 0 : index
    %40 = tpu.strided_load %arg1[%c0_50, %c2_51, %c0_52] {strides = array<i32: 1, 2, 1>} : memref<1x32x32xf32, #tpu.memory_space<vmem>>, vector<1x14x32xf32>
    %41 = vector.shape_cast %40 : vector<1x14x32xf32> to vector<14x32xf32>
    %c1_53 = arith.constant 1 : index
    %c2_54 = arith.constant 2 : index
    %c0_55 = arith.constant 0 : index
    %c0_56 = arith.constant 0 : index
    %42 = vector.load %arg2[%c1_53, %c2_54, %c0_55, %c0_56] : memref<2x5x32x84xf32, #tpu.memory_space<vmem>>, vector<1x1x32x84xf32>
    %43 = vector.shape_cast %42 : vector<1x1x32x84xf32> to vector<32x84xf32>
    %cst_57 = arith.constant dense<0.000000e+00> : vector<14x84xf32>
    %44 = tpu.matmul %41, %43, %cst_57 {dimension_numbers = #tpu.dot_dimension_numbers<[1], [0], [0], [1], [0, 0, 1, 1], [], []>} : vector<14x32xf32>, vector<32x84xf32>, vector<14x84xf32> -> vector<14x84xf32>
    %45 = arith.addf %39, %44 : vector<14x84xf32>
    %c0_58 = arith.constant 0 : index
    %c3_59 = arith.constant 3 : index
    %c0_60 = arith.constant 0 : index
    %46 = tpu.strided_load %arg1[%c0_58, %c3_59, %c0_60] {strides = array<i32: 1, 2, 1>} : memref<1x32x32xf32, #tpu.memory_space<vmem>>, vector<1x14x32xf32>
    %47 = vector.shape_cast %46 : vector<1x14x32xf32> to vector<14x32xf32>
    %c1_61 = arith.constant 1 : index
    %c3_62 = arith.constant 3 : index
    %c0_63 = arith.constant 0 : index
    %c0_64 = arith.constant 0 : index
    %48 = vector.load %arg2[%c1_61, %c3_62, %c0_63, %c0_64] : memref<2x5x32x84xf32, #tpu.memory_space<vmem>>, vector<1x1x32x84xf32>
    %49 = vector.shape_cast %48 : vector<1x1x32x84xf32> to vector<32x84xf32>
    %cst_65 = arith.constant dense<0.000000e+00> : vector<14x84xf32>
    %50 = tpu.matmul %47, %49, %cst_65 {dimension_numbers = #tpu.dot_dimension_numbers<[1], [0], [0], [1], [0, 0, 1, 1], [], []>} : vector<14x32xf32>, vector<32x84xf32>, vector<14x84xf32> -> vector<14x84xf32>
    %51 = arith.addf %45, %50 : vector<14x84xf32>
    %c0_66 = arith.constant 0 : index
    %c4_67 = arith.constant 4 : index
    %c0_68 = arith.constant 0 : index
    %52 = tpu.strided_load %arg1[%c0_66, %c4_67, %c0_68] {strides = array<i32: 1, 2, 1>} : memref<1x32x32xf32, #tpu.memory_space<vmem>>, vector<1x14x32xf32>
    %53 = vector.shape_cast %52 : vector<1x14x32xf32> to vector<14x32xf32>
    %c1_69 = arith.constant 1 : index
    %c4_70 = arith.constant 4 : index
    %c0_71 = arith.constant 0 : index
    %c0_72 = arith.constant 0 : index
    %54 = vector.load %arg2[%c1_69, %c4_70, %c0_71, %c0_72] : memref<2x5x32x84xf32, #tpu.memory_space<vmem>>, vector<1x1x32x84xf32>
    %55 = vector.shape_cast %54 : vector<1x1x32x84xf32> to vector<32x84xf32>
    %cst_73 = arith.constant dense<0.000000e+00> : vector<14x84xf32>
    %56 = tpu.matmul %53, %55, %cst_73 {dimension_numbers = #tpu.dot_dimension_numbers<[1], [0], [0], [1], [0, 0, 1, 1], [], []>} : vector<14x32xf32>, vector<32x84xf32>, vector<14x84xf32> -> vector<14x84xf32>
    %57 = arith.addf %51, %56 : vector<14x84xf32>
    %58 = arith.maximumf %28, %57 : vector<14x84xf32>
    %c0_74 = arith.constant 0 : index
    %c1_75 = arith.constant 1 : index
    %c0_76 = arith.constant 0 : index
    %59 = tpu.strided_load %arg1[%c0_74, %c1_75, %c0_76] {strides = array<i32: 1, 2, 1>} : memref<1x32x32xf32, #tpu.memory_space<vmem>>, vector<1x14x32xf32>
    %60 = vector.shape_cast %59 : vector<1x14x32xf32> to vector<14x32xf32>
    %c0_77 = arith.constant 0 : index
    %c0_78 = arith.constant 0 : index
    %c0_79 = arith.constant 0 : index
    %c0_80 = arith.constant 0 : index
    %61 = vector.load %arg2[%c0_77, %c0_78, %c0_79, %c0_80] : memref<2x5x32x84xf32, #tpu.memory_space<vmem>>, vector<1x1x32x84xf32>
    %62 = vector.shape_cast %61 : vector<1x1x32x84xf32> to vector<32x84xf32>
    %cst_81 = arith.constant dense<0.000000e+00> : vector<14x84xf32>
    %63 = tpu.matmul %60, %62, %cst_81 {dimension_numbers = #tpu.dot_dimension_numbers<[1], [0], [0], [1], [0, 0, 1, 1], [], []>} : vector<14x32xf32>, vector<32x84xf32>, vector<14x84xf32> -> vector<14x84xf32>
    %c0_82 = arith.constant 0 : index
    %c2_83 = arith.constant 2 : index
    %c0_84 = arith.constant 0 : index
    %64 = tpu.strided_load %arg1[%c0_82, %c2_83, %c0_84] {strides = array<i32: 1, 2, 1>} : memref<1x32x32xf32, #tpu.memory_space<vmem>>, vector<1x14x32xf32>
    %65 = vector.shape_cast %64 : vector<1x14x32xf32> to vector<14x32xf32>
    %c0_85 = arith.constant 0 : index
    %c1_86 = arith.constant 1 : index
    %c0_87 = arith.constant 0 : index
    %c0_88 = arith.constant 0 : index
    %66 = vector.load %arg2[%c0_85, %c1_86, %c0_87, %c0_88] : memref<2x5x32x84xf32, #tpu.memory_space<vmem>>, vector<1x1x32x84xf32>
    %67 = vector.shape_cast %66 : vector<1x1x32x84xf32> to vector<32x84xf32>
    %cst_89 = arith.constant dense<0.000000e+00> : vector<14x84xf32>
    %68 = tpu.matmul %65, %67, %cst_89 {dimension_numbers = #tpu.dot_dimension_numbers<[1], [0], [0], [1], [0, 0, 1, 1], [], []>} : vector<14x32xf32>, vector<32x84xf32>, vector<14x84xf32> -> vector<14x84xf32>
    %69 = arith.addf %63, %68 : vector<14x84xf32>
    %c0_90 = arith.constant 0 : index
    %c3_91 = arith.constant 3 : index
    %c0_92 = arith.constant 0 : index
    %70 = tpu.strided_load %arg1[%c0_90, %c3_91, %c0_92] {strides = array<i32: 1, 2, 1>} : memref<1x32x32xf32, #tpu.memory_space<vmem>>, vector<1x14x32xf32>
    %71 = vector.shape_cast %70 : vector<1x14x32xf32> to vector<14x32xf32>
    %c0_93 = arith.constant 0 : index
    %c2_94 = arith.constant 2 : index
    %c0_95 = arith.constant 0 : index
    %c0_96 = arith.constant 0 : index
    %72 = vector.load %arg2[%c0_93, %c2_94, %c0_95, %c0_96] : memref<2x5x32x84xf32, #tpu.memory_space<vmem>>, vector<1x1x32x84xf32>
    %73 = vector.shape_cast %72 : vector<1x1x32x84xf32> to vector<32x84xf32>
    %cst_97 = arith.constant dense<0.000000e+00> : vector<14x84xf32>
    %74 = tpu.matmul %71, %73, %cst_97 {dimension_numbers = #tpu.dot_dimension_numbers<[1], [0], [0], [1], [0, 0, 1, 1], [], []>} : vector<14x32xf32>, vector<32x84xf32>, vector<14x84xf32> -> vector<14x84xf32>
    %75 = arith.addf %69, %74 : vector<14x84xf32>
    %c0_98 = arith.constant 0 : index
    %c4_99 = arith.constant 4 : index
    %c0_100 = arith.constant 0 : index
    %76 = tpu.strided_load %arg1[%c0_98, %c4_99, %c0_100] {strides = array<i32: 1, 2, 1>} : memref<1x32x32xf32, #tpu.memory_space<vmem>>, vector<1x14x32xf32>
    %77 = vector.shape_cast %76 : vector<1x14x32xf32> to vector<14x32xf32>
    %c0_101 = arith.constant 0 : index
    %c3_102 = arith.constant 3 : index
    %c0_103 = arith.constant 0 : index
    %c0_104 = arith.constant 0 : index
    %78 = vector.load %arg2[%c0_101, %c3_102, %c0_103, %c0_104] : memref<2x5x32x84xf32, #tpu.memory_space<vmem>>, vector<1x1x32x84xf32>
    %79 = vector.shape_cast %78 : vector<1x1x32x84xf32> to vector<32x84xf32>
    %cst_105 = arith.constant dense<0.000000e+00> : vector<14x84xf32>
    %80 = tpu.matmul %77, %79, %cst_105 {dimension_numbers = #tpu.dot_dimension_numbers<[1], [0], [0], [1], [0, 0, 1, 1], [], []>} : vector<14x32xf32>, vector<32x84xf32>, vector<14x84xf32> -> vector<14x84xf32>
    %81 = arith.addf %75, %80 : vector<14x84xf32>
    %c0_106 = arith.constant 0 : index
    %c5 = arith.constant 5 : index
    %c0_107 = arith.constant 0 : index
    %82 = tpu.strided_load %arg1[%c0_106, %c5, %c0_107] {strides = array<i32: 1, 2, 1>} : memref<1x32x32xf32, #tpu.memory_space<vmem>>, vector<1x14x32xf32>
    %83 = vector.shape_cast %82 : vector<1x14x32xf32> to vector<14x32xf32>
    %c0_108 = arith.constant 0 : index
    %c4_109 = arith.constant 4 : index
    %c0_110 = arith.constant 0 : index
    %c0_111 = arith.constant 0 : index
    %84 = vector.load %arg2[%c0_108, %c4_109, %c0_110, %c0_111] : memref<2x5x32x84xf32, #tpu.memory_space<vmem>>, vector<1x1x32x84xf32>
    %85 = vector.shape_cast %84 : vector<1x1x32x84xf32> to vector<32x84xf32>
    %cst_112 = arith.constant dense<0.000000e+00> : vector<14x84xf32>
    %86 = tpu.matmul %83, %85, %cst_112 {dimension_numbers = #tpu.dot_dimension_numbers<[1], [0], [0], [1], [0, 0, 1, 1], [], []>} : vector<14x32xf32>, vector<32x84xf32>, vector<14x84xf32> -> vector<14x84xf32>
    %87 = arith.addf %81, %86 : vector<14x84xf32>
    %88 = arith.maximumf %58, %87 : vector<14x84xf32>
    %c0_113 = arith.constant 0 : index
    %c1_114 = arith.constant 1 : index
    %c0_115 = arith.constant 0 : index
    %89 = tpu.strided_load %arg1[%c0_113, %c1_114, %c0_115] {strides = array<i32: 1, 2, 1>} : memref<1x32x32xf32, #tpu.memory_space<vmem>>, vector<1x14x32xf32>
    %90 = vector.shape_cast %89 : vector<1x14x32xf32> to vector<14x32xf32>
    %c1_116 = arith.constant 1 : index
    %c0_117 = arith.constant 0 : index
    %c0_118 = arith.constant 0 : index
    %c0_119 = arith.constant 0 : index
    %91 = vector.load %arg2[%c1_116, %c0_117, %c0_118, %c0_119] : memref<2x5x32x84xf32, #tpu.memory_space<vmem>>, vector<1x1x32x84xf32>
    %92 = vector.shape_cast %91 : vector<1x1x32x84xf32> to vector<32x84xf32>
    %cst_120 = arith.constant dense<0.000000e+00> : vector<14x84xf32>
    %93 = tpu.matmul %90, %92, %cst_120 {dimension_numbers = #tpu.dot_dimension_numbers<[1], [0], [0], [1], [0, 0, 1, 1], [], []>} : vector<14x32xf32>, vector<32x84xf32>, vector<14x84xf32> -> vector<14x84xf32>
    %c0_121 = arith.constant 0 : index
    %c2_122 = arith.constant 2 : index
    %c0_123 = arith.constant 0 : index
    %94 = tpu.strided_load %arg1[%c0_121, %c2_122, %c0_123] {strides = array<i32: 1, 2, 1>} : memref<1x32x32xf32, #tpu.memory_space<vmem>>, vector<1x14x32xf32>
    %95 = vector.shape_cast %94 : vector<1x14x32xf32> to vector<14x32xf32>
    %c1_124 = arith.constant 1 : index
    %c1_125 = arith.constant 1 : index
    %c0_126 = arith.constant 0 : index
    %c0_127 = arith.constant 0 : index
    %96 = vector.load %arg2[%c1_124, %c1_125, %c0_126, %c0_127] : memref<2x5x32x84xf32, #tpu.memory_space<vmem>>, vector<1x1x32x84xf32>
    %97 = vector.shape_cast %96 : vector<1x1x32x84xf32> to vector<32x84xf32>
    %cst_128 = arith.constant dense<0.000000e+00> : vector<14x84xf32>
    %98 = tpu.matmul %95, %97, %cst_128 {dimension_numbers = #tpu.dot_dimension_numbers<[1], [0], [0], [1], [0, 0, 1, 1], [], []>} : vector<14x32xf32>, vector<32x84xf32>, vector<14x84xf32> -> vector<14x84xf32>
    %99 = arith.addf %93, %98 : vector<14x84xf32>
    %c0_129 = arith.constant 0 : index
    %c3_130 = arith.constant 3 : index
    %c0_131 = arith.constant 0 : index
    %100 = tpu.strided_load %arg1[%c0_129, %c3_130, %c0_131] {strides = array<i32: 1, 2, 1>} : memref<1x32x32xf32, #tpu.memory_space<vmem>>, vector<1x14x32xf32>
    %101 = vector.shape_cast %100 : vector<1x14x32xf32> to vector<14x32xf32>
    %c1_132 = arith.constant 1 : index
    %c2_133 = arith.constant 2 : index
    %c0_134 = arith.constant 0 : index
    %c0_135 = arith.constant 0 : index
    %102 = vector.load %arg2[%c1_132, %c2_133, %c0_134, %c0_135] : memref<2x5x32x84xf32, #tpu.memory_space<vmem>>, vector<1x1x32x84xf32>
    %103 = vector.shape_cast %102 : vector<1x1x32x84xf32> to vector<32x84xf32>
    %cst_136 = arith.constant dense<0.000000e+00> : vector<14x84xf32>
    %104 = tpu.matmul %101, %103, %cst_136 {dimension_numbers = #tpu.dot_dimension_numbers<[1], [0], [0], [1], [0, 0, 1, 1], [], []>} : vector<14x32xf32>, vector<32x84xf32>, vector<14x84xf32> -> vector<14x84xf32>
    %105 = arith.addf %99, %104 : vector<14x84xf32>
    %c0_137 = arith.constant 0 : index
    %c4_138 = arith.constant 4 : index
    %c0_139 = arith.constant 0 : index
    %106 = tpu.strided_load %arg1[%c0_137, %c4_138, %c0_139] {strides = array<i32: 1, 2, 1>} : memref<1x32x32xf32, #tpu.memory_space<vmem>>, vector<1x14x32xf32>
    %107 = vector.shape_cast %106 : vector<1x14x32xf32> to vector<14x32xf32>
    %c1_140 = arith.constant 1 : index
    %c3_141 = arith.constant 3 : index
    %c0_142 = arith.constant 0 : index
    %c0_143 = arith.constant 0 : index
    %108 = vector.load %arg2[%c1_140, %c3_141, %c0_142, %c0_143] : memref<2x5x32x84xf32, #tpu.memory_space<vmem>>, vector<1x1x32x84xf32>
    %109 = vector.shape_cast %108 : vector<1x1x32x84xf32> to vector<32x84xf32>
    %cst_144 = arith.constant dense<0.000000e+00> : vector<14x84xf32>
    %110 = tpu.matmul %107, %109, %cst_144 {dimension_numbers = #tpu.dot_dimension_numbers<[1], [0], [0], [1], [0, 0, 1, 1], [], []>} : vector<14x32xf32>, vector<32x84xf32>, vector<14x84xf32> -> vector<14x84xf32>
    %111 = arith.addf %105, %110 : vector<14x84xf32>
    %c0_145 = arith.constant 0 : index
    %c5_146 = arith.constant 5 : index
    %c0_147 = arith.constant 0 : index
    %112 = tpu.strided_load %arg1[%c0_145, %c5_146, %c0_147] {strides = array<i32: 1, 2, 1>} : memref<1x32x32xf32, #tpu.memory_space<vmem>>, vector<1x14x32xf32>
    %113 = vector.shape_cast %112 : vector<1x14x32xf32> to vector<14x32xf32>
    %c1_148 = arith.constant 1 : index
    %c4_149 = arith.constant 4 : index
    %c0_150 = arith.constant 0 : index
    %c0_151 = arith.constant 0 : index
    %114 = vector.load %arg2[%c1_148, %c4_149, %c0_150, %c0_151] : memref<2x5x32x84xf32, #tpu.memory_space<vmem>>, vector<1x1x32x84xf32>
    %115 = vector.shape_cast %114 : vector<1x1x32x84xf32> to vector<32x84xf32>
    %cst_152 = arith.constant dense<0.000000e+00> : vector<14x84xf32>
    %116 = tpu.matmul %113, %115, %cst_152 {dimension_numbers = #tpu.dot_dimension_numbers<[1], [0], [0], [1], [0, 0, 1, 1], [], []>} : vector<14x32xf32>, vector<32x84xf32>, vector<14x84xf32> -> vector<14x84xf32>
    %117 = arith.addf %111, %116 : vector<14x84xf32>
    %118 = arith.maximumf %88, %117 : vector<14x84xf32>
    %c0_153 = arith.constant 0 : index
    %c0_154 = arith.constant 0 : index
    %119 = vector.load %arg3[%c0_153, %c0_154] : memref<1x84xf32, #tpu.memory_space<vmem>>, vector<1x84xf32>
    %120 = vector.broadcast %119 : vector<1x84xf32> to vector<14x84xf32>
    %121 = arith.addf %118, %120 : vector<14x84xf32>
    %cst_155 = arith.constant 0.000000e+00 : f32
    %122 = vector.broadcast %cst_155 : f32 to vector<14x84xf32>
    %123 = arith.maximumf %121, %122 : vector<14x84xf32>
    %c0_156 = arith.constant 0 : index
    %c0_157 = arith.constant 0 : index
    %124 = vector.load %arg13[%c0_156, %c0_157] : memref<14x84xf32, #tpu.memory_space<vmem>>, vector<14x84xf32>
    tpu.vector_store %arg13[%c0_156, %c0_157], %123 {strides = array<i32>} : memref<14x84xf32, #tpu.memory_space<vmem>>, vector<14x84xf32>,
    %c0_158 = arith.constant 0 : index
    %c0_159 = arith.constant 0 : index
    %125 = tpu.strided_load %arg13[%c0_158, %c0_159] {strides = array<i32: 2, 1>} : memref<14x84xf32, #tpu.memory_space<vmem>>, vector<5x84xf32>
    %c0_160 = arith.constant 0 : index
    %c0_161 = arith.constant 0 : index
    %c0_162 = arith.constant 0 : index
    %c0_163 = arith.constant 0 : index
    %126 = vector.load %arg4[%c0_160, %c0_161, %c0_162, %c0_163] : memref<2x5x84x80xf32, #tpu.memory_space<vmem>>, vector<1x1x84x80xf32>
    %127 = vector.shape_cast %126 : vector<1x1x84x80xf32> to vector<84x80xf32>
    %cst_164 = arith.constant dense<0.000000e+00> : vector<5x80xf32>
    %128 = tpu.matmul %125, %127, %cst_164 {dimension_numbers = #tpu.dot_dimension_numbers<[1], [0], [0], [1], [0, 0, 1, 1], [], []>} : vector<5x84xf32>, vector<84x80xf32>, vector<5x80xf32> -> vector<5x80xf32>
    %c1_165 = arith.constant 1 : index
    %c0_166 = arith.constant 0 : index
    %129 = tpu.strided_load %arg13[%c1_165, %c0_166] {strides = array<i32: 2, 1>} : memref<14x84xf32, #tpu.memory_space<vmem>>, vector<5x84xf32>
    %c0_167 = arith.constant 0 : index
    %c1_168 = arith.constant 1 : index
    %c0_169 = arith.constant 0 : index
    %c0_170 = arith.constant 0 : index
    %130 = vector.load %arg4[%c0_167, %c1_168, %c0_169, %c0_170] : memref<2x5x84x80xf32, #tpu.memory_space<vmem>>, vector<1x1x84x80xf32>
    %131 = vector.shape_cast %130 : vector<1x1x84x80xf32> to vector<84x80xf32>
    %cst_171 = arith.constant dense<0.000000e+00> : vector<5x80xf32>
    %132 = tpu.matmul %129, %131, %cst_171 {dimension_numbers = #tpu.dot_dimension_numbers<[1], [0], [0], [1], [0, 0, 1, 1], [], []>} : vector<5x84xf32>, vector<84x80xf32>, vector<5x80xf32> -> vector<5x80xf32>
    %133 = arith.addf %128, %132 : vector<5x80xf32>
    %c2_172 = arith.constant 2 : index
    %c0_173 = arith.constant 0 : index
    %134 = tpu.strided_load %arg13[%c2_172, %c0_173] {strides = array<i32: 2, 1>} : memref<14x84xf32, #tpu.memory_space<vmem>>, vector<5x84xf32>
    %c0_174 = arith.constant 0 : index
    %c2_175 = arith.constant 2 : index
    %c0_176 = arith.constant 0 : index
    %c0_177 = arith.constant 0 : index
    %135 = vector.load %arg4[%c0_174, %c2_175, %c0_176, %c0_177] : memref<2x5x84x80xf32, #tpu.memory_space<vmem>>, vector<1x1x84x80xf32>
    %136 = vector.shape_cast %135 : vector<1x1x84x80xf32> to vector<84x80xf32>
    %cst_178 = arith.constant dense<0.000000e+00> : vector<5x80xf32>
    %137 = tpu.matmul %134, %136, %cst_178 {dimension_numbers = #tpu.dot_dimension_numbers<[1], [0], [0], [1], [0, 0, 1, 1], [], []>} : vector<5x84xf32>, vector<84x80xf32>, vector<5x80xf32> -> vector<5x80xf32>
    %138 = arith.addf %133, %137 : vector<5x80xf32>
    %c3_179 = arith.constant 3 : index
    %c0_180 = arith.constant 0 : index
    %139 = tpu.strided_load %arg13[%c3_179, %c0_180] {strides = array<i32: 2, 1>} : memref<14x84xf32, #tpu.memory_space<vmem>>, vector<5x84xf32>
    %c0_181 = arith.constant 0 : index
    %c3_182 = arith.constant 3 : index
    %c0_183 = arith.constant 0 : index
    %c0_184 = arith.constant 0 : index
    %140 = vector.load %arg4[%c0_181, %c3_182, %c0_183, %c0_184] : memref<2x5x84x80xf32, #tpu.memory_space<vmem>>, vector<1x1x84x80xf32>
    %141 = vector.shape_cast %140 : vector<1x1x84x80xf32> to vector<84x80xf32>
    %cst_185 = arith.constant dense<0.000000e+00> : vector<5x80xf32>
    %142 = tpu.matmul %139, %141, %cst_185 {dimension_numbers = #tpu.dot_dimension_numbers<[1], [0], [0], [1], [0, 0, 1, 1], [], []>} : vector<5x84xf32>, vector<84x80xf32>, vector<5x80xf32> -> vector<5x80xf32>
    %143 = arith.addf %138, %142 : vector<5x80xf32>
    %c4_186 = arith.constant 4 : index
    %c0_187 = arith.constant 0 : index
    %144 = tpu.strided_load %arg13[%c4_186, %c0_187] {strides = array<i32: 2, 1>} : memref<14x84xf32, #tpu.memory_space<vmem>>, vector<5x84xf32>
    %c0_188 = arith.constant 0 : index
    %c4_189 = arith.constant 4 : index
    %c0_190 = arith.constant 0 : index
    %c0_191 = arith.constant 0 : index
    %145 = vector.load %arg4[%c0_188, %c4_189, %c0_190, %c0_191] : memref<2x5x84x80xf32, #tpu.memory_space<vmem>>, vector<1x1x84x80xf32>
    %146 = vector.shape_cast %145 : vector<1x1x84x80xf32> to vector<84x80xf32>
    %cst_192 = arith.constant dense<0.000000e+00> : vector<5x80xf32>
    %147 = tpu.matmul %144, %146, %cst_192 {dimension_numbers = #tpu.dot_dimension_numbers<[1], [0], [0], [1], [0, 0, 1, 1], [], []>} : vector<5x84xf32>, vector<84x80xf32>, vector<5x80xf32> -> vector<5x80xf32>
    %148 = arith.addf %143, %147 : vector<5x80xf32>
    %c0_193 = arith.constant 0 : index
    %c0_194 = arith.constant 0 : index
    %149 = tpu.strided_load %arg13[%c0_193, %c0_194] {strides = array<i32: 2, 1>} : memref<14x84xf32, #tpu.memory_space<vmem>>, vector<5x84xf32>
    %c1_195 = arith.constant 1 : index
    %c0_196 = arith.constant 0 : index
    %c0_197 = arith.constant 0 : index
    %c0_198 = arith.constant 0 : index
    %150 = vector.load %arg4[%c1_195, %c0_196, %c0_197, %c0_198] : memref<2x5x84x80xf32, #tpu.memory_space<vmem>>, vector<1x1x84x80xf32>
    %151 = vector.shape_cast %150 : vector<1x1x84x80xf32> to vector<84x80xf32>
    %cst_199 = arith.constant dense<0.000000e+00> : vector<5x80xf32>
    %152 = tpu.matmul %149, %151, %cst_199 {dimension_numbers = #tpu.dot_dimension_numbers<[1], [0], [0], [1], [0, 0, 1, 1], [], []>} : vector<5x84xf32>, vector<84x80xf32>, vector<5x80xf32> -> vector<5x80xf32>
    %c1_200 = arith.constant 1 : index
    %c0_201 = arith.constant 0 : index
    %153 = tpu.strided_load %arg13[%c1_200, %c0_201] {strides = array<i32: 2, 1>} : memref<14x84xf32, #tpu.memory_space<vmem>>, vector<5x84xf32>
    %c1_202 = arith.constant 1 : index
    %c1_203 = arith.constant 1 : index
    %c0_204 = arith.constant 0 : index
    %c0_205 = arith.constant 0 : index
    %154 = vector.load %arg4[%c1_202, %c1_203, %c0_204, %c0_205] : memref<2x5x84x80xf32, #tpu.memory_space<vmem>>, vector<1x1x84x80xf32>
    %155 = vector.shape_cast %154 : vector<1x1x84x80xf32> to vector<84x80xf32>
    %cst_206 = arith.constant dense<0.000000e+00> : vector<5x80xf32>
    %156 = tpu.matmul %153, %155, %cst_206 {dimension_numbers = #tpu.dot_dimension_numbers<[1], [0], [0], [1], [0, 0, 1, 1], [], []>} : vector<5x84xf32>, vector<84x80xf32>, vector<5x80xf32> -> vector<5x80xf32>
    %157 = arith.addf %152, %156 : vector<5x80xf32>
    %c2_207 = arith.constant 2 : index
    %c0_208 = arith.constant 0 : index
    %158 = tpu.strided_load %arg13[%c2_207, %c0_208] {strides = array<i32: 2, 1>} : memref<14x84xf32, #tpu.memory_space<vmem>>, vector<5x84xf32>
    %c1_209 = arith.constant 1 : index
    %c2_210 = arith.constant 2 : index
    %c0_211 = arith.constant 0 : index
    %c0_212 = arith.constant 0 : index
    %159 = vector.load %arg4[%c1_209, %c2_210, %c0_211, %c0_212] : memref<2x5x84x80xf32, #tpu.memory_space<vmem>>, vector<1x1x84x80xf32>
    %160 = vector.shape_cast %159 : vector<1x1x84x80xf32> to vector<84x80xf32>
    %cst_213 = arith.constant dense<0.000000e+00> : vector<5x80xf32>
    %161 = tpu.matmul %158, %160, %cst_213 {dimension_numbers = #tpu.dot_dimension_numbers<[1], [0], [0], [1], [0, 0, 1, 1], [], []>} : vector<5x84xf32>, vector<84x80xf32>, vector<5x80xf32> -> vector<5x80xf32>
    %162 = arith.addf %157, %161 : vector<5x80xf32>
    %c3_214 = arith.constant 3 : index
    %c0_215 = arith.constant 0 : index
    %163 = tpu.strided_load %arg13[%c3_214, %c0_215] {strides = array<i32: 2, 1>} : memref<14x84xf32, #tpu.memory_space<vmem>>, vector<5x84xf32>
    %c1_216 = arith.constant 1 : index
    %c3_217 = arith.constant 3 : index
    %c0_218 = arith.constant 0 : index
    %c0_219 = arith.constant 0 : index
    %164 = vector.load %arg4[%c1_216, %c3_217, %c0_218, %c0_219] : memref<2x5x84x80xf32, #tpu.memory_space<vmem>>, vector<1x1x84x80xf32>
    %165 = vector.shape_cast %164 : vector<1x1x84x80xf32> to vector<84x80xf32>
    %cst_220 = arith.constant dense<0.000000e+00> : vector<5x80xf32>
    %166 = tpu.matmul %163, %165, %cst_220 {dimension_numbers = #tpu.dot_dimension_numbers<[1], [0], [0], [1], [0, 0, 1, 1], [], []>} : vector<5x84xf32>, vector<84x80xf32>, vector<5x80xf32> -> vector<5x80xf32>
    %167 = arith.addf %162, %166 : vector<5x80xf32>
    %c4_221 = arith.constant 4 : index
    %c0_222 = arith.constant 0 : index
    %168 = tpu.strided_load %arg13[%c4_221, %c0_222] {strides = array<i32: 2, 1>} : memref<14x84xf32, #tpu.memory_space<vmem>>, vector<5x84xf32>
    %c1_223 = arith.constant 1 : index
    %c4_224 = arith.constant 4 : index
    %c0_225 = arith.constant 0 : index
    %c0_226 = arith.constant 0 : index
    %169 = vector.load %arg4[%c1_223, %c4_224, %c0_225, %c0_226] : memref<2x5x84x80xf32, #tpu.memory_space<vmem>>, vector<1x1x84x80xf32>
    %170 = vector.shape_cast %169 : vector<1x1x84x80xf32> to vector<84x80xf32>
    %cst_227 = arith.constant dense<0.000000e+00> : vector<5x80xf32>
    %171 = tpu.matmul %168, %170, %cst_227 {dimension_numbers = #tpu.dot_dimension_numbers<[1], [0], [0], [1], [0, 0, 1, 1], [], []>} : vector<5x84xf32>, vector<84x80xf32>, vector<5x80xf32> -> vector<5x80xf32>
    %172 = arith.addf %167, %171 : vector<5x80xf32>
    %173 = arith.maximumf %148, %172 : vector<5x80xf32>
    %c1_228 = arith.constant 1 : index
    %c0_229 = arith.constant 0 : index
    %174 = tpu.strided_load %arg13[%c1_228, %c0_229] {strides = array<i32: 2, 1>} : memref<14x84xf32, #tpu.memory_space<vmem>>, vector<5x84xf32>
    %c0_230 = arith.constant 0 : index
    %c0_231 = arith.constant 0 : index
    %c0_232 = arith.constant 0 : index
    %c0_233 = arith.constant 0 : index
    %175 = vector.load %arg4[%c0_230, %c0_231, %c0_232, %c0_233] : memref<2x5x84x80xf32, #tpu.memory_space<vmem>>, vector<1x1x84x80xf32>
    %176 = vector.shape_cast %175 : vector<1x1x84x80xf32> to vector<84x80xf32>
    %cst_234 = arith.constant dense<0.000000e+00> : vector<5x80xf32>
    %177 = tpu.matmul %174, %176, %cst_234 {dimension_numbers = #tpu.dot_dimension_numbers<[1], [0], [0], [1], [0, 0, 1, 1], [], []>} : vector<5x84xf32>, vector<84x80xf32>, vector<5x80xf32> -> vector<5x80xf32>
    %c2_235 = arith.constant 2 : index
    %c0_236 = arith.constant 0 : index
    %178 = tpu.strided_load %arg13[%c2_235, %c0_236] {strides = array<i32: 2, 1>} : memref<14x84xf32, #tpu.memory_space<vmem>>, vector<5x84xf32>
    %c0_237 = arith.constant 0 : index
    %c1_238 = arith.constant 1 : index
    %c0_239 = arith.constant 0 : index
    %c0_240 = arith.constant 0 : index
    %179 = vector.load %arg4[%c0_237, %c1_238, %c0_239, %c0_240] : memref<2x5x84x80xf32, #tpu.memory_space<vmem>>, vector<1x1x84x80xf32>
    %180 = vector.shape_cast %179 : vector<1x1x84x80xf32> to vector<84x80xf32>
    %cst_241 = arith.constant dense<0.000000e+00> : vector<5x80xf32>
    %181 = tpu.matmul %178, %180, %cst_241 {dimension_numbers = #tpu.dot_dimension_numbers<[1], [0], [0], [1], [0, 0, 1, 1], [], []>} : vector<5x84xf32>, vector<84x80xf32>, vector<5x80xf32> -> vector<5x80xf32>
    %182 = arith.addf %177, %181 : vector<5x80xf32>
    %c3_242 = arith.constant 3 : index
    %c0_243 = arith.constant 0 : index
    %183 = tpu.strided_load %arg13[%c3_242, %c0_243] {strides = array<i32: 2, 1>} : memref<14x84xf32, #tpu.memory_space<vmem>>, vector<5x84xf32>
    %c0_244 = arith.constant 0 : index
    %c2_245 = arith.constant 2 : index
    %c0_246 = arith.constant 0 : index
    %c0_247 = arith.constant 0 : index
    %184 = vector.load %arg4[%c0_244, %c2_245, %c0_246, %c0_247] : memref<2x5x84x80xf32, #tpu.memory_space<vmem>>, vector<1x1x84x80xf32>
    %185 = vector.shape_cast %184 : vector<1x1x84x80xf32> to vector<84x80xf32>
    %cst_248 = arith.constant dense<0.000000e+00> : vector<5x80xf32>
    %186 = tpu.matmul %183, %185, %cst_248 {dimension_numbers = #tpu.dot_dimension_numbers<[1], [0], [0], [1], [0, 0, 1, 1], [], []>} : vector<5x84xf32>, vector<84x80xf32>, vector<5x80xf32> -> vector<5x80xf32>
    %187 = arith.addf %182, %186 : vector<5x80xf32>
    %c4_249 = arith.constant 4 : index
    %c0_250 = arith.constant 0 : index
    %188 = tpu.strided_load %arg13[%c4_249, %c0_250] {strides = array<i32: 2, 1>} : memref<14x84xf32, #tpu.memory_space<vmem>>, vector<5x84xf32>
    %c0_251 = arith.constant 0 : index
    %c3_252 = arith.constant 3 : index
    %c0_253 = arith.constant 0 : index
    %c0_254 = arith.constant 0 : index
    %189 = vector.load %arg4[%c0_251, %c3_252, %c0_253, %c0_254] : memref<2x5x84x80xf32, #tpu.memory_space<vmem>>, vector<1x1x84x80xf32>
    %190 = vector.shape_cast %189 : vector<1x1x84x80xf32> to vector<84x80xf32>
    %cst_255 = arith.constant dense<0.000000e+00> : vector<5x80xf32>
    %191 = tpu.matmul %188, %190, %cst_255 {dimension_numbers = #tpu.dot_dimension_numbers<[1], [0], [0], [1], [0, 0, 1, 1], [], []>} : vector<5x84xf32>, vector<84x80xf32>, vector<5x80xf32> -> vector<5x80xf32>
    %192 = arith.addf %187, %191 : vector<5x80xf32>
    %c5_256 = arith.constant 5 : index
    %c0_257 = arith.constant 0 : index
    %193 = tpu.strided_load %arg13[%c5_256, %c0_257] {strides = array<i32: 2, 1>} : memref<14x84xf32, #tpu.memory_space<vmem>>, vector<5x84xf32>
    %c0_258 = arith.constant 0 : index
    %c4_259 = arith.constant 4 : index
    %c0_260 = arith.constant 0 : index
    %c0_261 = arith.constant 0 : index
    %194 = vector.load %arg4[%c0_258, %c4_259, %c0_260, %c0_261] : memref<2x5x84x80xf32, #tpu.memory_space<vmem>>, vector<1x1x84x80xf32>
    %195 = vector.shape_cast %194 : vector<1x1x84x80xf32> to vector<84x80xf32>
    %cst_262 = arith.constant dense<0.000000e+00> : vector<5x80xf32>
    %196 = tpu.matmul %193, %195, %cst_262 {dimension_numbers = #tpu.dot_dimension_numbers<[1], [0], [0], [1], [0, 0, 1, 1], [], []>} : vector<5x84xf32>, vector<84x80xf32>, vector<5x80xf32> -> vector<5x80xf32>
    %197 = arith.addf %192, %196 : vector<5x80xf32>
    %198 = arith.maximumf %173, %197 : vector<5x80xf32>
    %c1_263 = arith.constant 1 : index
    %c0_264 = arith.constant 0 : index
    %199 = tpu.strided_load %arg13[%c1_263, %c0_264] {strides = array<i32: 2, 1>} : memref<14x84xf32, #tpu.memory_space<vmem>>, vector<5x84xf32>
    %c1_265 = arith.constant 1 : index
    %c0_266 = arith.constant 0 : index
    %c0_267 = arith.constant 0 : index
    %c0_268 = arith.constant 0 : index
    %200 = vector.load %arg4[%c1_265, %c0_266, %c0_267, %c0_268] : memref<2x5x84x80xf32, #tpu.memory_space<vmem>>, vector<1x1x84x80xf32>
    %201 = vector.shape_cast %200 : vector<1x1x84x80xf32> to vector<84x80xf32>
    %cst_269 = arith.constant dense<0.000000e+00> : vector<5x80xf32>
    %202 = tpu.matmul %199, %201, %cst_269 {dimension_numbers = #tpu.dot_dimension_numbers<[1], [0], [0], [1], [0, 0, 1, 1], [], []>} : vector<5x84xf32>, vector<84x80xf32>, vector<5x80xf32> -> vector<5x80xf32>
    %c2_270 = arith.constant 2 : index
    %c0_271 = arith.constant 0 : index
    %203 = tpu.strided_load %arg13[%c2_270, %c0_271] {strides = array<i32: 2, 1>} : memref<14x84xf32, #tpu.memory_space<vmem>>, vector<5x84xf32>
    %c1_272 = arith.constant 1 : index
    %c1_273 = arith.constant 1 : index
    %c0_274 = arith.constant 0 : index
    %c0_275 = arith.constant 0 : index
    %204 = vector.load %arg4[%c1_272, %c1_273, %c0_274, %c0_275] : memref<2x5x84x80xf32, #tpu.memory_space<vmem>>, vector<1x1x84x80xf32>
    %205 = vector.shape_cast %204 : vector<1x1x84x80xf32> to vector<84x80xf32>
    %cst_276 = arith.constant dense<0.000000e+00> : vector<5x80xf32>
    %206 = tpu.matmul %203, %205, %cst_276 {dimension_numbers = #tpu.dot_dimension_numbers<[1], [0], [0], [1], [0, 0, 1, 1], [], []>} : vector<5x84xf32>, vector<84x80xf32>, vector<5x80xf32> -> vector<5x80xf32>
    %207 = arith.addf %202, %206 : vector<5x80xf32>
    %c3_277 = arith.constant 3 : index
    %c0_278 = arith.constant 0 : index
    %208 = tpu.strided_load %arg13[%c3_277, %c0_278] {strides = array<i32: 2, 1>} : memref<14x84xf32, #tpu.memory_space<vmem>>, vector<5x84xf32>
    %c1_279 = arith.constant 1 : index
    %c2_280 = arith.constant 2 : index
    %c0_281 = arith.constant 0 : index
    %c0_282 = arith.constant 0 : index
    %209 = vector.load %arg4[%c1_279, %c2_280, %c0_281, %c0_282] : memref<2x5x84x80xf32, #tpu.memory_space<vmem>>, vector<1x1x84x80xf32>
    %210 = vector.shape_cast %209 : vector<1x1x84x80xf32> to vector<84x80xf32>
    %cst_283 = arith.constant dense<0.000000e+00> : vector<5x80xf32>
    %211 = tpu.matmul %208, %210, %cst_283 {dimension_numbers = #tpu.dot_dimension_numbers<[1], [0], [0], [1], [0, 0, 1, 1], [], []>} : vector<5x84xf32>, vector<84x80xf32>, vector<5x80xf32> -> vector<5x80xf32>
    %212 = arith.addf %207, %211 : vector<5x80xf32>
    %c4_284 = arith.constant 4 : index
    %c0_285 = arith.constant 0 : index
    %213 = tpu.strided_load %arg13[%c4_284, %c0_285] {strides = array<i32: 2, 1>} : memref<14x84xf32, #tpu.memory_space<vmem>>, vector<5x84xf32>
    %c1_286 = arith.constant 1 : index
    %c3_287 = arith.constant 3 : index
    %c0_288 = arith.constant 0 : index
    %c0_289 = arith.constant 0 : index
    %214 = vector.load %arg4[%c1_286, %c3_287, %c0_288, %c0_289] : memref<2x5x84x80xf32, #tpu.memory_space<vmem>>, vector<1x1x84x80xf32>
    %215 = vector.shape_cast %214 : vector<1x1x84x80xf32> to vector<84x80xf32>
    %cst_290 = arith.constant dense<0.000000e+00> : vector<5x80xf32>
    %216 = tpu.matmul %213, %215, %cst_290 {dimension_numbers = #tpu.dot_dimension_numbers<[1], [0], [0], [1], [0, 0, 1, 1], [], []>} : vector<5x84xf32>, vector<84x80xf32>, vector<5x80xf32> -> vector<5x80xf32>
    %217 = arith.addf %212, %216 : vector<5x80xf32>
    %c5_291 = arith.constant 5 : index
    %c0_292 = arith.constant 0 : index
    %218 = tpu.strided_load %arg13[%c5_291, %c0_292] {strides = array<i32: 2, 1>} : memref<14x84xf32, #tpu.memory_space<vmem>>, vector<5x84xf32>
    %c1_293 = arith.constant 1 : index
    %c4_294 = arith.constant 4 : index
    %c0_295 = arith.constant 0 : index
    %c0_296 = arith.constant 0 : index
    %219 = vector.load %arg4[%c1_293, %c4_294, %c0_295, %c0_296] : memref<2x5x84x80xf32, #tpu.memory_space<vmem>>, vector<1x1x84x80xf32>
    %220 = vector.shape_cast %219 : vector<1x1x84x80xf32> to vector<84x80xf32>
    %cst_297 = arith.constant dense<0.000000e+00> : vector<5x80xf32>
    %221 = tpu.matmul %218, %220, %cst_297 {dimension_numbers = #tpu.dot_dimension_numbers<[1], [0], [0], [1], [0, 0, 1, 1], [], []>} : vector<5x84xf32>, vector<84x80xf32>, vector<5x80xf32> -> vector<5x80xf32>
    %222 = arith.addf %217, %221 : vector<5x80xf32>
    %223 = arith.maximumf %198, %222 : vector<5x80xf32>
    %c0_298 = arith.constant 0 : index
    %c0_299 = arith.constant 0 : index
    %224 = vector.load %arg5[%c0_298, %c0_299] : memref<1x80xf32, #tpu.memory_space<vmem>>, vector<1x80xf32>
    %225 = vector.broadcast %224 : vector<1x80xf32> to vector<5x80xf32>
    %226 = arith.addf %223, %225 : vector<5x80xf32>
    %cst_300 = arith.constant 0.000000e+00 : f32
    %227 = vector.broadcast %cst_300 : f32 to vector<5x80xf32>
    %228 = arith.maximumf %226, %227 : vector<5x80xf32>
    %c0_301 = arith.constant 0 : index
    %c0_302 = arith.constant 0 : index
    %229 = vector.load %arg7[%c0_301, %c0_302] : memref<1x120xf32, #tpu.memory_space<vmem>>, vector<1x120xf32>
    %230 = vector.extract_strided_slice %228 {offsets = [0, 0], sizes = [1, 80], strides = [1, 1]} : vector<5x80xf32> to vector<1x80xf32>
    %c0_303 = arith.constant 0 : index
    %c0_304 = arith.constant 0 : index
    %c0_305 = arith.constant 0 : index
    %231 = vector.load %arg6[%c0_303, %c0_304, %c0_305] : memref<5x80x120xf32, #tpu.memory_space<vmem>>, vector<1x80x120xf32>
    %232 = vector.shape_cast %231 : vector<1x80x120xf32> to vector<80x120xf32>
    %cst_306 = arith.constant dense<0.000000e+00> : vector<1x120xf32>
    %233 = tpu.matmul %230, %232, %cst_306 {dimension_numbers = #tpu.dot_dimension_numbers<[1], [0], [0], [1], [0, 0, 1, 1], [], []>} : vector<1x80xf32>, vector<80x120xf32>, vector<1x120xf32> -> vector<1x120xf32>
    %234 = arith.addf %229, %233 : vector<1x120xf32>
    %235 = vector.extract_strided_slice %228 {offsets = [1, 0], sizes = [1, 80], strides = [1, 1]} : vector<5x80xf32> to vector<1x80xf32>
    %c1_307 = arith.constant 1 : index
    %c0_308 = arith.constant 0 : index
    %c0_309 = arith.constant 0 : index
    %236 = vector.load %arg6[%c1_307, %c0_308, %c0_309] : memref<5x80x120xf32, #tpu.memory_space<vmem>>, vector<1x80x120xf32>
    %237 = vector.shape_cast %236 : vector<1x80x120xf32> to vector<80x120xf32>
    %cst_310 = arith.constant dense<0.000000e+00> : vector<1x120xf32>
    %238 = tpu.matmul %235, %237, %cst_310 {dimension_numbers = #tpu.dot_dimension_numbers<[1], [0], [0], [1], [0, 0, 1, 1], [], []>} : vector<1x80xf32>, vector<80x120xf32>, vector<1x120xf32> -> vector<1x120xf32>
    %239 = arith.addf %234, %238 : vector<1x120xf32>
    %240 = vector.extract_strided_slice %228 {offsets = [2, 0], sizes = [1, 80], strides = [1, 1]} : vector<5x80xf32> to vector<1x80xf32>
    %c2_311 = arith.constant 2 : index
    %c0_312 = arith.constant 0 : index
    %c0_313 = arith.constant 0 : index
    %241 = vector.load %arg6[%c2_311, %c0_312, %c0_313] : memref<5x80x120xf32, #tpu.memory_space<vmem>>, vector<1x80x120xf32>
    %242 = vector.shape_cast %241 : vector<1x80x120xf32> to vector<80x120xf32>
    %cst_314 = arith.constant dense<0.000000e+00> : vector<1x120xf32>
    %243 = tpu.matmul %240, %242, %cst_314 {dimension_numbers = #tpu.dot_dimension_numbers<[1], [0], [0], [1], [0, 0, 1, 1], [], []>} : vector<1x80xf32>, vector<80x120xf32>, vector<1x120xf32> -> vector<1x120xf32>
    %244 = arith.addf %239, %243 : vector<1x120xf32>
    %245 = vector.extract_strided_slice %228 {offsets = [3, 0], sizes = [1, 80], strides = [1, 1]} : vector<5x80xf32> to vector<1x80xf32>
    %c3_315 = arith.constant 3 : index
    %c0_316 = arith.constant 0 : index
    %c0_317 = arith.constant 0 : index
    %246 = vector.load %arg6[%c3_315, %c0_316, %c0_317] : memref<5x80x120xf32, #tpu.memory_space<vmem>>, vector<1x80x120xf32>
    %247 = vector.shape_cast %246 : vector<1x80x120xf32> to vector<80x120xf32>
    %cst_318 = arith.constant dense<0.000000e+00> : vector<1x120xf32>
    %248 = tpu.matmul %245, %247, %cst_318 {dimension_numbers = #tpu.dot_dimension_numbers<[1], [0], [0], [1], [0, 0, 1, 1], [], []>} : vector<1x80xf32>, vector<80x120xf32>, vector<1x120xf32> -> vector<1x120xf32>
    %249 = arith.addf %244, %248 : vector<1x120xf32>
    %250 = vector.extract_strided_slice %228 {offsets = [4, 0], sizes = [1, 80], strides = [1, 1]} : vector<5x80xf32> to vector<1x80xf32>
    %c4_319 = arith.constant 4 : index
    %c0_320 = arith.constant 0 : index
    %c0_321 = arith.constant 0 : index
    %251 = vector.load %arg6[%c4_319, %c0_320, %c0_321] : memref<5x80x120xf32, #tpu.memory_space<vmem>>, vector<1x80x120xf32>
    %252 = vector.shape_cast %251 : vector<1x80x120xf32> to vector<80x120xf32>
    %cst_322 = arith.constant dense<0.000000e+00> : vector<1x120xf32>
    %253 = tpu.matmul %250, %252, %cst_322 {dimension_numbers = #tpu.dot_dimension_numbers<[1], [0], [0], [1], [0, 0, 1, 1], [], []>} : vector<1x80xf32>, vector<80x120xf32>, vector<1x120xf32> -> vector<1x120xf32>
    %254 = arith.addf %249, %253 : vector<1x120xf32>
    %cst_323 = arith.constant 0.000000e+00 : f32
    %255 = vector.broadcast %cst_323 : f32 to vector<1x120xf32>
    %256 = arith.maximumf %254, %255 : vector<1x120xf32>
    %c0_324 = arith.constant 0 : index
    %c0_325 = arith.constant 0 : index
    %257 = vector.load %arg8[%c0_324, %c0_325] : memref<120x84xf32, #tpu.memory_space<vmem>>, vector<120x84xf32>
    %cst_326 = arith.constant dense<0.000000e+00> : vector<1x84xf32>
    %258 = tpu.matmul %256, %257, %cst_326 {dimension_numbers = #tpu.dot_dimension_numbers<[1], [0], [0], [1], [0, 0, 1, 1], [], []>} : vector<1x120xf32>, vector<120x84xf32>, vector<1x84xf32> -> vector<1x84xf32>
    %c0_327 = arith.constant 0 : index
    %c0_328 = arith.constant 0 : index
    %259 = vector.load %arg9[%c0_327, %c0_328] : memref<1x84xf32, #tpu.memory_space<vmem>>, vector<1x84xf32>
    %260 = arith.addf %258, %259 : vector<1x84xf32>
    %cst_329 = arith.constant 0.000000e+00 : f32
    %261 = vector.broadcast %cst_329 : f32 to vector<1x84xf32>
    %262 = arith.maximumf %260, %261 : vector<1x84xf32>
    %c0_330 = arith.constant 0 : index
    %c0_331 = arith.constant 0 : index
    %263 = vector.load %arg10[%c0_330, %c0_331] : memref<84x10xf32, #tpu.memory_space<vmem>>, vector<84x10xf32>
    %cst_332 = arith.constant dense<0.000000e+00> : vector<1x10xf32>
    %264 = tpu.matmul %262, %263, %cst_332 {dimension_numbers = #tpu.dot_dimension_numbers<[1], [0], [0], [1], [0, 0, 1, 1], [], []>} : vector<1x84xf32>, vector<84x10xf32>, vector<1x10xf32> -> vector<1x10xf32>
    %c0_333 = arith.constant 0 : index
    %c0_334 = arith.constant 0 : index
    %265 = vector.load %arg11[%c0_333, %c0_334] : memref<1x10xf32, #tpu.memory_space<vmem>>, vector<1x10xf32>
    %266 = arith.addf %264, %265 : vector<1x10xf32>
    %cst_335 = arith.constant 0.000000e+00 : f32
    %267 = vector.broadcast %cst_335 : f32 to vector<1x10xf32>
    %268 = arith.maximumf %266, %267 : vector<1x10xf32>
    %c0_336 = arith.constant 0 : index
    %c0_337 = arith.constant 0 : index
    %c0_338 = arith.constant 0 : index
    %269 = vector.load %arg12[%c0_336, %c0_337, %c0_338] : memref<1x1x10xf32, #tpu.memory_space<vmem>>, vector<1x1x10xf32>
    %270 = vector.shape_cast %269 : vector<1x1x10xf32> to vector<1x10xf32>
    %271 = vector.shape_cast %268 : vector<1x10xf32> to vector<1x1x10xf32>
    tpu.vector_store %arg12[%c0_336, %c0_337, %c0_338], %271 {strides = array<i32>} : memref<1x1x10xf32, #tpu.memory_space<vmem>>, vector<1x1x10xf32>,
    return
  }
  func.func @transform_0(%arg0: i32) -> (i32, i32, i32) {
    %c0_i32 = arith.constant 0 : i32
    %c0_i32_0 = arith.constant 0 : i32
    %c0_i32_1 = arith.constant 0 : i32
    return %arg0, %c0_i32, %c0_i32_0 : i32, i32, i32
  }
  func.func @transform_1(%arg0: i32) -> (i32, i32, i32, i32) {
    %c0_i32 = arith.constant 0 : i32
    %c0_i32_0 = arith.constant 0 : i32
    %c0_i32_1 = arith.constant 0 : i32
    %c0_i32_2 = arith.constant 0 : i32
    %c0_i32_3 = arith.constant 0 : i32
    return %c0_i32, %c0_i32_0, %c0_i32_1, %c0_i32_2 : i32, i32, i32, i32
  }
  func.func @transform_2(%arg0: i32) -> (i32, i32) {
    %c0_i32 = arith.constant 0 : i32
    %c0_i32_0 = arith.constant 0 : i32
    %c0_i32_1 = arith.constant 0 : i32
    return %c0_i32, %c0_i32_0 : i32, i32
  }
  func.func @transform_3(%arg0: i32) -> (i32, i32, i32, i32) {
    %c0_i32 = arith.constant 0 : i32
    %c0_i32_0 = arith.constant 0 : i32
    %c0_i32_1 = arith.constant 0 : i32
    %c0_i32_2 = arith.constant 0 : i32
    %c0_i32_3 = arith.constant 0 : i32
    return %c0_i32, %c0_i32_0, %c0_i32_1, %c0_i32_2 : i32, i32, i32, i32
  }
  func.func @transform_4(%arg0: i32) -> (i32, i32) {
    %c0_i32 = arith.constant 0 : i32
    %c0_i32_0 = arith.constant 0 : i32
    %c0_i32_1 = arith.constant 0 : i32
    return %c0_i32, %c0_i32_0 : i32, i32
  }
  func.func @transform_5(%arg0: i32) -> (i32, i32, i32) {
    %c0_i32 = arith.constant 0 : i32
    %c0_i32_0 = arith.constant 0 : i32
    %c0_i32_1 = arith.constant 0 : i32
    %c0_i32_2 = arith.constant 0 : i32
    return %c0_i32, %c0_i32_0, %c0_i32_1 : i32, i32, i32
  }
  func.func @transform_6(%arg0: i32) -> (i32, i32) {
    %c0_i32 = arith.constant 0 : i32
    %c0_i32_0 = arith.constant 0 : i32
    %c0_i32_1 = arith.constant 0 : i32
    return %c0_i32, %c0_i32_0 : i32, i32
  }
  func.func @transform_7(%arg0: i32) -> (i32, i32) {
    %c0_i32 = arith.constant 0 : i32
    %c0_i32_0 = arith.constant 0 : i32
    %c0_i32_1 = arith.constant 0 : i32
    return %c0_i32, %c0_i32_0 : i32, i32
  }
  func.func @transform_8(%arg0: i32) -> (i32, i32) {
    %c0_i32 = arith.constant 0 : i32
    %c0_i32_0 = arith.constant 0 : i32
    %c0_i32_1 = arith.constant 0 : i32
    return %c0_i32, %c0_i32_0 : i32, i32
  }
  func.func @transform_9(%arg0: i32) -> (i32, i32) {
    %c0_i32 = arith.constant 0 : i32
    %c0_i32_0 = arith.constant 0 : i32
    %c0_i32_1 = arith.constant 0 : i32
    return %c0_i32, %c0_i32_0 : i32, i32
  }
  func.func @transform_10(%arg0: i32) -> (i32, i32) {
    %c0_i32 = arith.constant 0 : i32
    %c0_i32_0 = arith.constant 0 : i32
    %c0_i32_1 = arith.constant 0 : i32
    return %c0_i32, %c0_i32_0 : i32, i32
  }
  func.func @transform_11(%arg0: i32) -> (i32, i32, i32) {
    %c0_i32 = arith.constant 0 : i32
    %c0_i32_0 = arith.constant 0 : i32
    %c0_i32_1 = arith.constant 0 : i32
    return %arg0, %c0_i32, %c0_i32_0 : i32, i32, i32
  }
}

</mosaic_0001>

<bundles_post_ra>
// kernel: lenet_forward.1
= control target key start
LH: loop header
LB: loop body
LE: loop exit
PB: predicated region body
PF: predicated region fallthrough
CT: control target
= control target key end

     0   :  { %s4004_s0 = inlined_call_operand.vmem [shape: f32[2,32,32], index: 0, kind: input, shape index: {}]   ;;  %s4005_s1 = inlined_call_operand.vmem [shape: f32[2,5,32,84], index: 1, kind: input, shape index: {}]   ;;  %s4006_s2 = inlined_call_operand.vmem [shape: f32[1,84], index: 2, kind: input, shape index: {}]   ;;  %s4007_s3 = inlined_call_operand.vmem [shape: f32[2,5,84,80], index: 3, kind: input, shape index: {}]   ;;  %s4008_s4 = inlined_call_operand.vmem [shape: f32[1,80], index: 4, kind: input, shape index: {}]   ;;  %s4009_s5 = inlined_call_operand.vmem [shape: f32[5,80,120], index: 5, kind: input, shape index: {}]   ;;  %s4010_s6 = inlined_call_operand.vmem [shape: f32[1,120], index: 6, kind: input, shape index: {}]   ;;  %s4011_s7 = inlined_call_operand.vmem [shape: f32[120,84], index: 7, kind: input, shape index: {}]   ;;  %s4012_s8 = inlined_call_operand.vmem [shape: f32[1,84], index: 8, kind: input, shape index: {}]   ;;  %s4013_s9 = inlined_call_operand.vmem [shape: f32[84,10], index: 9, kind: input, shape index: {}]   ;;  %s4014_s10 = inlined_call_operand.vmem [shape: f32[1,10], index: 10, kind: input, shape index: {}]   ;;  %s4015_s11 = inlined_call_operand.hbm [shape: f32[2,1,10], index: 11, kind: output, shape index: {}]  }
   0x1   :  { %4076 = sst [smem:[#allocation66_spill]] %s4004_s0 }
   0x2   :  { %16 = vsyncpa [#allocation4], 0 }
   0x3   :  { %18 = vsyncpa [#allocation4 + $0x1], 0  ;;  %s2370_s17 = smov 0   ;;  %s2372_s18 = smov 0  }
   0x4   :  { %s2374_s19 = smov 0   ;;  %s2376_s20 = smov 0  }
   0x5 LB: > { %s2391_s21 = sadd.s32 4294967295, %s2308_s20   ;;  %s1922_s22 = sadd.s32 4294967294, %s2308_s20   ;;  %s2308_s20 = sphi %s2376_s20, %s4203_s20   ;;  %s2304_s19 = sphi %s2374_s19, %s4202_s19   ;;  %s2300_s18 = sphi %s2372_s18, %s4201_s18   ;;  %s2296_s17 = sphi %s2370_s17, %s4200_s17  }
   0x6   : > { %s2395_s23 = sadd.s32 1, %s2308_s20   ;;  %s267_s24 = sadd.s32 1, %s2304_s19 }
   0x7   : > { %s264_s25 = ssub.s32 %s2308_s20, %s2395_s23  ;;  %p277_p0 = scmp.ne.s32.totalorder %s2304_s19, %s2300_s18 }
   0x8   : > { %p265_p1 = scmp.eq.s32.totalorder %s264_s25, 0  ;;  %p278_p2 = scmp.eq.s32.totalorder %s2391_s21, 1 }
   0x9   : > { %p283_p3 = scmp.ne.s32.totalorder %s2300_s18, %s2296_s17  ;;  %p284_p4 = scmp.eq.s32.totalorder %s1922_s22, 1 }
   0xa   : > { %s2406_s26 = scalar_select %p265_p1, %s2304_s19, %s267_s24  }
   0xb   : > { %p2408_p5 = por %p278_p2, %p277_p0  ;;  %p2412_p6 = por %p284_p4, %p283_p3 }
   0xc   : > { %p1925_p7 = scmp.ge.s32.totalorder %s2308_s20, 1  ;;  %p340_p8 = scmp.lt.s32.totalorder %s2308_s20, 3 }
   0xe   : > { %p341_p9 = pnand %p1925_p7, %p340_p8 }
  0x10   : > { %344 = sbr.rel (%p341_p9) target bundleno = 894 (0x37e), region = 64 }
  0x15   : > { %v2421_v0 = vld [vmem:[%s4005_s1 + $0x18] sm:$0xff]  ;;  %v2426_v1 = vld [vmem:[%s4005_s1 + $0x10] sm:$0xff]  ;;  %p379_p10 = scmp.lt.s32.totalorder %s2391_s21, 1  ;;  %v2449_v5 = vld [vmem:[%s4005_s1 + $0x8] sm:$0xff]  ;;  %s4079_s0 = sld [smem:[#allocation66_spill]]  ;;  %vm400_vm0 = vcmask 261120  }
  0x16   : > { %v2431_v2 = vld [vmem:[%s4005_s1 + $0x58] sm:$0xff]  ;;  %448 = vmatpush.msra.mxu3 %v2421_v0  ;;  %v2439_v3 = vld [vmem:[%s4005_s1 + $0x50] sm:$0xff]  ;;  %v2455_v6 = vld [vmem:[%s4005_s1 + $0x48] sm:$0xff]  ;;  %vm1024_vm1 = vcmask 1043456   ;;  %vm991_vm2 = vcmask 687104   ;;  %vm993_vm3 = vcmask 685056   ;;  %s1863_s13 = scalar_lea.hbm %s4015_s11, %s2391_s21 }
  0x17   : > { %486 = vmatpush.msra.mxu2 %v2431_v2  ;;  %v2444_v4 = vld [vmem:[%s4005_s1 + $0x38] sm:$0xff]  ;;  %s380_s14 = scalar_select %p379_p10, %s2391_s21, 1  ;;  %v2461_v7 = vld [vmem:[%s4005_s1 + $0x30] sm:$0xff]  ;;  %v2468_v8 = vld [vmem:[%s4005_s1 + $0x28] sm:$0xff]  ;;  %vm1606_vm4 = vcmask 654336   ;;  %vm1788_vm5 = vcmask 982016  }
  0x18   : > { %419 = vmatpush.msra.mxu0 %v2444_v4  ;;  %449 = vmatpush.msra.mxu3 %v2426_v1  ;;  %v2473_v9 = vld [vmem:[%s4005_s1] sm:$0xff]  ;;  %v2503_v14 = vld [vmem:[%s4005_s1 + $0x78] sm:$0xff]  ;;  %v2522_v17 = vld [vmem:[%s4005_s1 + $0x70] sm:$0xff]  ;;  %s1867_s25 = sshll.u32 %s1863_s13, 4  ;;  %vm1852_vm6 = vcmask 73728   ;;  %s2266_s15 = scalar_lea.hbm %s4015_s11, 2  ;;  %s1868_s25 = int_to_ptr.hbm [resolvable:$true] %s1867_s25 }
  0x19   : > { %487 = vmatpush.msra.mxu2 %v2439_v3  ;;  %s2204_s30 = sshll.u32 %s380_s14, 5  ;;  %v2479_v10 = vld [vmem:[%s4005_s1 + $0x40] sm:$0xff]  ;;  %v2513_v16 = vld [vmem:[%s4005_s1 + $0xb8] sm:$0xff]  ;;  %v2534_v19 = vld [vmem:[%s4005_s1 + $0xb0] sm:$0xff] }
  0x1a   : > { %420 = vmatpush.msra.mxu0 %v2461_v7  ;;  %450 = vmatpush.msra.mxu3 %v2449_v5  ;;  %v2491_v11 = vld [vmem:[%s4005_s1 + $0x20] sm:$0xff]  ;;  %v2527_v18 = vld [vmem:[%s4005_s1 + $0x98] sm:$0xff]  ;;  %v2546_v21 = vld [vmem:[%s4005_s1 + $0x68] sm:$0xff] }
  0x1b   : > { %488 = vmatpush.msra.mxu2 %v2455_v6  ;;  %s2486_s22 = scalar_lea.vmem %s4079_s0, %s2204_s30  ;;  %v2539_v20 = vld [vmem:[%s4005_s1 + $0xd8] sm:$0xff]  ;;  %v2552_v22 = vld [vmem:[%s4005_s1 + $0x90] sm:$0xff]  ;;  %v2559_v23 = vld [vmem:[%s4005_s1 + $0xa8] sm:$0xff]  ;;  %s2260_s0 = sshra.s32 %s1868_s25, 4  ;;  %s2261_s0 = int_to_ptr.hbm [resolvable:$true] %s2260_s0 }
  0x1c   : > { %v2494_v12 = vld [vmem:[%s2486_s22] ss:$2 sm:$0xff]  ;;  %421 = vmatpush.msra.mxu0 %v2468_v8  ;;  %451 = vmatpush.msra.mxu3 %v2473_v9  ;;  %v2508_v15 = vld [vmem:[%s2486_s22 + $0x1] ss:$2 sm:$0xff]  ;;  %v2564_v24 = vld [vmem:[%s4005_s1 + $0xd0] sm:$0xff]  ;;  %s2262_s30 = scalar_lea.hbm %s2261_s0, 1  ;;  %p2267_p0 = scmp.lt.s32.totalorder %s2261_s0, %s4015_s11 }
  0x1d   : > { %v2497_v13 = vld [vmem:[%s2486_s22 + $0x2] ss:$2 sm:$0xff]  ;;  %489 = vmatpush.msra.mxu2 %v2479_v10  ;;  %1937 = vmatmul.msk.f32.vlgmr.msra.gmra.mxu3 %vm400_vm0, %v2494_v12  ;;  %v2580_v28 = vld [vmem:[%s2486_s22 + $0x12] ss:$2 sm:$0x3f]  ;;  %p2263_p11 = scmp.ne.s32.totalorder %s2261_s0, %s2262_s30  ;;  %p2268_p1 = scmp.lt.s32.totalorder %s2266_s15, %s2262_s30 }
  0x1e   : > { %1945 = vmatmul.msk.f32.vlgmr.msra.gmra.mxu2 %vm400_vm0, %v2497_v13  ;;  %422 = vmatpush.msra.mxu0 %v2491_v11  ;;  %v2569_v25 = vld [vmem:[%s4005_s1 + $0x60] sm:$0xff]  ;;  %v2576_v26 = vld [vmem:[%s4005_s1 + $0x88] sm:$0xff]  ;;  %v1928_v27 = vld [vmem:[%s2486_s22 + $0x10] ss:$2 sm:$0x3f] }
  0x1f   : > { %526 = vmatpush.msrb.mxu3 %v2503_v14  ;;  %1935 = vmatmul.msk.f32.vlgmr.msra.gmra.mxu0 %vm400_vm0, %v2508_v15  ;;  %v2589_v29 = vld [vmem:[%s4005_s1 + $0xa0] sm:$0xff]  ;;  %v2597_v31 = vld [vmem:[%s2486_s22 + $0x11] ss:$2 sm:$0x3f]  ;;  %v2604_v32 = vld [vmem:[%s4005_s1 + $0xc8] sm:$0xff]  ;;  %p2264_p12 = pnand %p2263_p11, %p2408_p5  ;;  %p2269_p2 = por %p2268_p1, %p2267_p0 }
  0x20   : > { %624 = vmatpush.msrb.mxu2 %v2513_v16  ;;  %566 = vmatpush.msrb.mxu0 %v2527_v18  ;;  %v2594_v30 = vld [vmem:[%s4005_s1 + $0x80] sm:$0xff]  ;;  %v2617_v34 = vld [vmem:[%s4005_s1 + $0xf8] sm:$0xff]  ;;  %v2632_v36 = vld [vmem:[%s4005_s1 + $0xf0] sm:$0xff] }
  0x21   : > { %527 = vmatpush.msrb.mxu3 %v2522_v17  ;;  %601 = vmatpush.msra.mxu1 %v2539_v20  ;;  %v2612_v33 = vld [vmem:[%s4005_s1 + $0xc0] sm:$0xff]  ;;  %v2624_v35 = vld [vmem:[%s4005_s1 + $0x118] sm:$0xff]  ;;  %v1983_v37 = vld [vmem:[%s4005_s1 + $0x110] sm:$0xff]  ;;  %p2265_p13 = pneg %p2264_p12 }
  0x22   : > { %625 = vmatpush.msrb.mxu2 %v2534_v19  ;;  %567 = vmatpush.msrb.mxu0 %v2552_v22  ;;  %v2643_v38 = vld [vmem:[%s4005_s1 + $0xe8] sm:$0xff]  ;;  %v2649_v39 = vld [vmem:[%s4005_s1 + $0x138] sm:$0xff]  ;;  %v2660_v41 = vld [vmem:[%s4005_s1 + $0xe0] sm:$0xff] }
  0x23   : > { %528 = vmatpush.msrb.mxu3 %v2546_v21  ;;  %602 = vmatpush.msra.mxu1 %v2564_v24  ;;  %v2652_v40 = vld [vmem:[%s2486_s22 + $0x3] ss:$2 sm:$0xff]  ;;  %v2664_v42 = vld [vmem:[%s2486_s22 + $0x4] ss:$2 sm:$0xff]  ;;  %p2270_p3 = pnand %p2269_p2, %p2265_p13 }
  0x24   : > { %626 = vmatpush.msrb.mxu2 %v2559_v23  ;;  %568 = vmatpush.msrb.mxu0 %v2576_v26  ;;  %v2671_v43 = vld [vmem:[%s4005_s1 + $0x130] sm:$0xff]  ;;  %v1982_v44 = vld [vmem:[%s4005_s1 + $0x108] sm:$0xff]  ;;  %v1981_v46 = vld [vmem:[%s4005_s1 + $0x100] sm:$0xff] }
  0x25   : > { %529 = vmatpush.msrb.mxu3 %v2569_v25  ;;  %603 = vmatpush.msra.mxu1 %v2604_v32  ;;  %v2685_v45 = vld [vmem:[%s4005_s1 + $0x128] sm:$0xff]  ;;  %v1987_v47 = vld [vmem:[%s4005_s1 + $0x120] sm:$0xff]  ;;  %v2700_v48 = vld [vmem:[%s2486_s22 + $0x13] ss:$2 sm:$0x3f] }
  0x26   : > { %1938 = vmatmul.msk.f32.gmra.mxu3 %vm400_vm0, %v1928_v27  ;;  %1946 = vmatmul.msk.f32.gmra.mxu2 %vm400_vm0, %v2580_v28  ;;  %v1956_v49 = vld [vmem:[%s2486_s22 + $0x14] ss:$2 sm:$0x3f]  ;;  %v2001_v50 = vld [vmem:[%s2486_s22 + $0x5] ss:$2 sm:$0xff] }
  0x27   : > { %627 = vmatpush.msrb.mxu2 %v2589_v29  ;;  %569 = vmatpush.msrb.mxu0 %v2594_v30  ;;  %v2002_v51 = vld [vmem:[%s2486_s22 + $0x15] ss:$2 sm:$0x3f]  ;;  %s377_s22 = sand.u32 1, %s2300_s18  }
  0x28   : > { %1936 = vmatmul.msk.f32.gmra.mxu0 %vm400_vm0, %v2597_v31  ;;  %652 = vmatpush.msra.mxu3 %v2617_v34  ;;  %s378_s14 = scalar_lea.vmem [#allocation3], %s377_s22  ;;  %s1855_s29 = scalar_lea.sflag [#allocation4], %s377_s22 }
  0x29   : > { %739 = vmatpush.msra.mxu2 %v2444_v4  ;;  %604 = vmatpush.msra.mxu1 %v2612_v33  ;;  %v2822_v4 = vld [vmem:[%s4007_s3 + $0xa8] sm:$0xf]  ;;  %s1865_s24 = sshll.u32 %s378_s14, 4  ;;  %s1866_s24 = int_to_ptr.vmem [resolvable:$true] %s1865_s24 }
  0x2a   : > { %682 = vmatpush.msra.mxu0 %v2624_v35  ;;  %1971 = vmatmul.msk.f32.vlgmr.msra.gmra.mxu1 %vm400_vm0, %v2508_v15 }
  0x2b   : > { %653 = vmatpush.msra.mxu3 %v2632_v36  ;;  %740 = vmatpush.msra.mxu2 %v2461_v7  ;;  %v2841_v7 = vld [vmem:[%s4007_s3 + $0x158] sm:$0xf] }
  0x2c   : > { %683 = vmatpush.msra.mxu0 %v1983_v37  ;;  %712 = vmatpush.msrb.mxu1 %v2649_v39 }
  0x2d   : > { %654 = vmatpush.msra.mxu3 %v2643_v38  ;;  %741 = vmatpush.msra.mxu2 %v2468_v8 }
  0x2e   : > { %1953 = vmatmul.msk.f32.vlgmr.msrb.gmra.mxu3 %vm400_vm0, %v2652_v40  ;;  %1973 = vmatmul.msk.f32.vlgmr.msrb.gmra.mxu2 %vm400_vm0, %v2494_v12  ;;  %v2869_v12 = vld [vmem:[%s4007_s3 + $0x150] sm:$0xff] }
  0x2f   : > { %655 = vmatpush.msra.mxu3 %v2660_v41  ;;  %713 = vmatpush.msrb.mxu1 %v2671_v43  ;;  %4081 = vst [vmem:[#allocation7_spill] sm:$0xff] %v2869_v12 }
  0x30   : > { %1961 = vmatmul.msk.f32.vlgmr.msrb.gmra.mxu0 %vm400_vm0, %v2664_v42  ;;  %742 = vmatpush.msra.mxu2 %v2491_v11  ;;  %v2862_v11 = vld [vmem:[%s4007_s3 + $0xf8] sm:$0xff] }
  0x31   : > { %684 = vmatpush.msra.mxu0 %v1982_v44  ;;  %714 = vmatpush.msrb.mxu1 %v2685_v45  ;;  %4080 = vst [vmem:[#allocation6_spill] sm:$0xff] %v2862_v11 }
  0x32   : > { %762 = vmatpush.msrb.mxu3 %v2421_v0  ;;  %1972 = vmatmul.msk.f32.gmra.mxu1 %vm400_vm0, %v2597_v31 }
  0x33   : > { %685 = vmatpush.msra.mxu0 %v1981_v46  ;;  %715 = vmatpush.msrb.mxu1 %v1987_v47 }
  0x34   : > { %763 = vmatpush.msrb.mxu3 %v2426_v1  ;;  %845 = vmatpush.msrb.mxu2 %v2527_v18 }
  0x35   : > { %785 = vmatpush.msrb.mxu0 %v2431_v2  ;;  %810 = vmatpush.msra.mxu1 %v2503_v14  ;;  %v2878_v14 = vld [vmem:[%s4007_s3 + $0x98] sm:$0xff] }
  0x36   : > { %1954 = vmatmul.msk.f32.gmra.mxu3 %vm400_vm0, %v2700_v48  ;;  %1974 = vmatmul.msk.f32.gmra.mxu2 %vm400_vm0, %v1928_v27 }
  0x37   : > { %764 = vmatpush.msrb.mxu3 %v2449_v5  ;;  %846 = vmatpush.msrb.mxu2 %v2552_v22  ;;  %v2827_v5 = vld [vmem:[%s4007_s3 + $0x50] sm:$0xf]  ;;  %v2921_v22 = vld [vmem:[%s4007_s3 + $0x140] sm:$0xff] }
  0x38   : > { %1962 = vmatmul.msk.f32.gmra.mxu0 %vm400_vm0, %v1956_v49  ;;  %811 = vmatpush.msra.mxu1 %v2522_v17  ;;  %v2895_v17 = vld [vmem:[%s4007_s3 + $0x148] sm:$0xff]  ;;  %4085 = vst [vmem:[#allocation11_spill] sm:$0xff] %v2921_v22 }
  0x39   : > { %765 = vmatpush.msrb.mxu3 %v2473_v9  ;;  %786 = vmatpush.msrb.mxu0 %v2439_v3  ;;  %v2852_v9 = vld [vmem:[%s4007_s3 + $0xa0] sm:$0xff]  ;;  %4083 = vst [vmem:[#allocation9_spill] sm:$0xff] %v2895_v17 }
  0x3a   : > { %847 = vmatpush.msrb.mxu2 %v2576_v26  ;;  %1991 = vmatmul.msk.f32.vlgmr.msrb.gmra.mxu1 %vm400_vm0, %v2664_v42  ;;  %v2943_v26 = vld [vmem:[%s4007_s3 + $0x138] sm:$0xff] }
  0x3b   : > { %787 = vmatpush.msrb.mxu0 %v2455_v6  ;;  %812 = vmatpush.msra.mxu1 %v2546_v21  ;;  %v2836_v6 = vld [vmem:[%s4007_s3 + $0x100] sm:$0xf]  ;;  %v2914_v21 = vld [vmem:[%s4007_s3 + $0xe8] sm:$0xff]  ;;  %4087 = vst [vmem:[#allocation13_spill] sm:$0xff] %v2943_v26 }
  0x3c   : > { %848 = vmatpush.msrb.mxu2 %v2594_v30  ;;  %4084 = vst [vmem:[#allocation10_spill] sm:$0xff] %v2914_v21  ;;  %v2961_v30 = vld [vmem:[%s4007_s3 + $0x28] sm:$0xff] }
  0x3d   : > { %788 = vmatpush.msrb.mxu0 %v2479_v10  ;;  %813 = vmatpush.msra.mxu1 %v2569_v25  ;;  %v2857_v10 = vld [vmem:[%s4007_s3 + $0x48] sm:$0xff]  ;;  %v2938_v25 = vld [vmem:[%s4007_s3 + $0xe0] sm:$0xff] }
  0x3e   : > { %1979 = vmatmul.msk.f32.vlgmr.msra.gmra.mxu3 %vm400_vm0, %v2497_v13  ;;  %1993 = vmatmul.msk.f32.vlgmr.msra.gmra.mxu2 %vm400_vm0, %v2497_v13  ;;  %4086 = vst [vmem:[#allocation12_spill] sm:$0xff] %v2938_v25 }
  0x3f   : > { %872 = vmatpush.msra.mxu3 %v2539_v20  ;;  %943 = vmatpush.msra.mxu2 %v2624_v35  ;;  %v2909_v20 = vld [vmem:[%s4007_s3 + $0x38] sm:$0xff]  ;;  %v2990_v35 = vld [vmem:[%s4007_s3 + $0xd0] sm:$0xff] }
  0x40   : > { %1985 = vmatmul.msk.f32.vlgmr.msra.gmra.mxu0 %vm400_vm0, %v2652_v40  ;;  %918 = vmatpush.msrb.mxu1 %v2617_v34  ;;  %v2985_v34 = vld [vmem:[%s4007_s3 + $0x20] sm:$0xff]  ;;  %4090 = vst [vmem:[#allocation16_spill] sm:$0xff] %v2990_v35 }
  0x41   : > { %873 = vmatpush.msra.mxu3 %v2564_v24  ;;  %895 = vmatpush.msra.mxu0 %v2513_v16  ;;  %v2888_v16 = vld [vmem:[%s4007_s3 + $0xf0] sm:$0xff] }
  0x42   : > { %944 = vmatpush.msra.mxu2 %v1983_v37  ;;  %1992 = vmatmul.msk.f32.gmra.mxu1 %vm400_vm0, %v1956_v49  ;;  %4082 = vst [vmem:[#allocation8_spill] sm:$0xff] %v2888_v16  ;;  %v2931_v24 = vld [vmem:[%s4007_s3 + $0x30] sm:$0xff] }
  0x43   : > { %874 = vmatpush.msra.mxu3 %v2604_v32  ;;  %896 = vmatpush.msra.mxu0 %v2534_v19  ;;  %v2904_v19 = vld [vmem:[%s4007_s3 + $0x90] sm:$0xff] }
  0x44   : > { %945 = vmatpush.msra.mxu2 %v1982_v44  ;;  %919 = vmatpush.msrb.mxu1 %v2632_v36  ;;  %v2973_v32 = vld [vmem:[%s4007_s3 + $0x130] sm:$0xff]  ;;  %v2997_v36 = vld [vmem:[%s4007_s3 + $0x128] sm:$0xff] }
  0x45   : > { %875 = vmatpush.msra.mxu3 %v2612_v33  ;;  %897 = vmatpush.msra.mxu0 %v2559_v23  ;;  %v2926_v23 = vld [vmem:[%s4007_s3 + $0x88] sm:$0xff]  ;;  %4089 = vst [vmem:[#allocation15_spill] sm:$0xff] %v2973_v32  ;;  %v2980_v33 = vld [vmem:[%s4007_s3 + $0x78] sm:$0xff] }
  0x46   : > { %1980 = vmatmul.msk.f32.gmra.mxu3 %vm400_vm0, %v2580_v28  ;;  %1994 = vmatmul.msk.f32.gmra.mxu2 %vm400_vm0, %v2580_v28  ;;  %4091 = vst [vmem:[#allocation17_spill] sm:$0xff] %v2997_v36 }
  0x47   : > { %946 = vmatpush.msra.mxu2 %v1981_v46  ;;  %920 = vmatpush.msrb.mxu1 %v2643_v38  ;;  %v3006_v38 = vld [vmem:[%s4007_s3 + $0x70] sm:$0xff]  ;;  %v3047_v46 = vld [vmem:[%s4007_s3 + $0x118] sm:$0xff] }
  0x48   : > { %1986 = vmatmul.msk.f32.gmra.mxu0 %vm400_vm0, %v2700_v48  ;;  %4095 = vst [vmem:[#allocation21_spill] sm:$0xff] %v3047_v46 }
  0x49   : > { %898 = vmatpush.msra.mxu0 %v2589_v29  ;;  %921 = vmatpush.msrb.mxu1 %v2660_v41  ;;  %v2956_v29 = vld [vmem:[%s4007_s3 + $0x80] sm:$0xff] }
  0x4a   : > { %1999 = vmatmul.msk.f32.vlgmr.msra.gmra.mxu1 %vm400_vm0, %v2664_v42  ;;  %v3023_v41 = vld [vmem:[%s4007_s3 + $0x120] sm:$0xff] }
  0x4b   : > { %2028 = vmatpush.msk.msra.mxu1 %vm1024_vm1, %v2827_v5  ;;  %4093 = vst [vmem:[#allocation19_spill] sm:$0xff] %v3023_v41 }
  0x4d   : > { %1060 = vmatpush.msra.mxu1 %v2857_v10 }
  0x4e   : > { %1995 = vmatmul.msk.f32.vlgmr.msrb.gmra.mxu3 %vm400_vm0, %v2508_v15  ;;  %2003 = vmatmul.msk.f32.vlgmr.msrb.gmra.mxu2 %vm400_vm0, %v2001_v50 }
  0x4f   : > { %968 = vmatpush.msrb.mxu3 %v2649_v39  ;;  %2041 = vmatpush.msk.msrb.mxu2 %vm1024_vm1, %v2836_v6  ;;  %v3011_v39 = vld [vmem:[%s4007_s3 + $0x18] sm:$0xff] }
  0x50   : > { %1997 = vmatmul.msk.f32.vlgmr.msrb.gmra.mxu0 %vm400_vm0, %v2652_v40 }
  0x51   : > { %969 = vmatpush.msrb.mxu3 %v2671_v43  ;;  %2026 = vmatpush.msk.msrb.mxu0 %vm1024_vm1, %v2822_v4  ;;  %v3033_v43 = vld [vmem:[%s4007_s3 + $0x10] sm:$0xff] }
  0x52   : > { %2000 = vmatmul.msk.f32.gmra.mxu1 %vm400_vm0, %v1956_v49  ;;  %1100 = vmatpush.msrb.mxu2 %v2862_v11 }
  0x53   : > { %970 = vmatpush.msrb.mxu3 %v2685_v45  ;;  %1034 = vmatpush.msrb.mxu0 %v2852_v9  ;;  %v3042_v45 = vld [vmem:[%s4007_s3 + $0xc0] sm:$0xff] }
  0x54   : > { %1101 = vmatpush.msrb.mxu2 %v2888_v16  ;;  %4094 = vst [vmem:[#allocation20_spill] sm:$0xff] %v3042_v45  ;;  %v3181_v16 = vld [vmem:[%s4007_s3 + $0x2a8] sm:$0xff] }
  0x55   : > { %971 = vmatpush.msrb.mxu3 %v1987_v47  ;;  %1035 = vmatpush.msrb.mxu0 %v2878_v14  ;;  %4110 = vst [vmem:[#allocation36_spill] sm:$0xff] %v3181_v16 }
  0x56   : > { %1996 = vmatmul.msk.f32.gmra.mxu3 %vm400_vm0, %v2597_v31  ;;  %2004 = vmatmul.msk.f32.gmra.mxu2 %vm400_vm0, %v2002_v51 }
  0x57   : > { %1036 = vmatpush.msrb.mxu0 %v2904_v19  ;;  %1102 = vmatpush.msrb.mxu2 %v2914_v21 }
  0x58   : > { %1998 = vmatmul.msk.f32.gmra.mxu0 %vm400_vm0, %v2700_v48 }
  0x59   : > { %1037 = vmatpush.msrb.mxu0 %v2926_v23  ;;  %1103 = vmatpush.msrb.mxu2 %v2938_v25  ;;  %v3153_v25 = vld [vmem:[%s4007_s3 + $0x2b0] sm:$0xff] }
  0x5a   : > { %2009 = vmatmul.msk.f32.vlgmr.msrb.gmra.mxu1 %vm400_vm0, %v2652_v40  ;;  %v3016_v40 = vld [vmem:[%s4007_s3 + $0xc8] sm:$0xff]  ;;  %4106 = vst [vmem:[#allocation32_spill] sm:$0xff] %v3153_v25 }
  0x5b   : > { %1038 = vmatpush.msrb.mxu0 %v2956_v29  ;;  %4092 = vst [vmem:[#allocation18_spill] sm:$0xff] %v3016_v40 }
  0x5d   : > { %1039 = vmatpush.msrb.mxu0 %v2980_v33 }
  0x5e   : > { %2005 = vmatmul.msk.f32.vlgmr.msra.gmra.mxu3 %vm400_vm0, %v2497_v13  ;;  %2011 = vmatmul.msk.f32.vlgmr.msra.gmra.mxu2 %vm400_vm0, %v2664_v42  ;;  %v3028_v42 = vld [vmem:[%s4007_s3 + $0x68] sm:$0xff] }
  0x5f   : > { %2054 = vmatpush.msk.msra.mxu3 %vm1024_vm1, %v2841_v7  ;;  %1040 = vmatpush.msrb.mxu0 %v3006_v38 }
  0x60   : > { %2007 = vmatmul.msk.f32.vlgmr.msra.gmra.mxu0 %vm400_vm0, %v2508_v15  ;;  %v2883_v15 = vld [vmem:[%s4007_s3 + $0x40] sm:$0xff] }
  0x61   : > { %1141 = vmatpush.msra.mxu3 %v2869_v12  ;;  %1061 = vmatpush.msra.mxu1 %v2883_v15 }
  0x62   : > { %2010 = vmatmul.msk.f32.gmra.mxu1 %vm400_vm0, %v2700_v48  ;;  %1041 = vmatpush.msrb.mxu0 %v3028_v42  ;;  %v3058_v48 = vld [vmem:[%s4007_s3 + $0x60] sm:$0xff] }
  0x63   : > { %1142 = vmatpush.msra.mxu3 %v2895_v17  ;;  %1062 = vmatpush.msra.mxu1 %v2909_v20 }
  0x64   : > { %1042 = vmatpush.msrb.mxu0 %v3058_v48 }
  0x65   : > { %1143 = vmatpush.msra.mxu3 %v2921_v22  ;;  %1063 = vmatpush.msra.mxu1 %v2931_v24  ;;  %v3160_v22 = vld [vmem:[%s4007_s3 + $0x1a0] sm:$0xff] }
  0x66   : > { %2006 = vmatmul.msk.f32.gmra.mxu3 %vm400_vm0, %v2580_v28  ;;  %2012 = vmatmul.msk.f32.gmra.mxu2 %vm400_vm0, %v1956_v49  ;;  %v3063_v49 = vld [vmem:[%s4007_s3 + $0x8] sm:$0xff]  ;;  %4107 = vst [vmem:[#allocation33_spill] sm:$0xff] %v3160_v22 }
  0x67   : > { %1144 = vmatpush.msra.mxu3 %v2943_v26  ;;  %1064 = vmatpush.msra.mxu1 %v2961_v30 }
  0x68   : > { %2008 = vmatmul.msk.f32.gmra.mxu0 %vm400_vm0, %v2597_v31  ;;  %v2966_v31 = vld [vmem:[%s4007_s3 + $0xd8] sm:$0xff] }
  0x69   : > { %4088 = vst [vmem:[#allocation14_spill] sm:$0xff] %v2966_v31  ;;  %1104 = vmatpush.msrb.mxu2 %v2966_v31  ;;  %1145 = vmatpush.msra.mxu3 %v2973_v32  ;;  %v3123_v32 = vld [vmem:[%s4007_s3 + $0x2b8] sm:$0xf]  ;;  %v3142_v31 = vld [vmem:[%s4007_s3 + $0x200] sm:$0xff] }
  0x6a   : > { %1065 = vmatpush.msra.mxu1 %v2985_v34  ;;  %4102 = vst [vmem:[#allocation28_spill] sm:$0xff] %v3123_v32 }
  0x6b   : > { %1105 = vmatpush.msrb.mxu2 %v2990_v35  ;;  %1146 = vmatpush.msra.mxu3 %v2997_v36  ;;  %v3113_v36 = vld [vmem:[%s4007_s3 + $0x260] sm:$0xf]  ;;  %v3118_v35 = vld [vmem:[%s4007_s3 + $0x208] sm:$0xf]  ;;  %4105 = vst [vmem:[#allocation31_spill] sm:$0xff] %v3142_v31 }
  0x6c   : > { %1066 = vmatpush.msra.mxu1 %v3011_v39  ;;  %4100 = vst [vmem:[#allocation26_spill] sm:$0xff] %v3113_v36 }
  0x6d   : > { %1106 = vmatpush.msrb.mxu2 %v3016_v40  ;;  %1147 = vmatpush.msra.mxu3 %v3023_v41  ;;  %v3089_v41 = vld [vmem:[%s4007_s3] sm:$0xff]  ;;  %v3094_v40 = vld [vmem:[%s4007_s3 + $0xb0] sm:$0xff]  ;;  %4101 = vst [vmem:[#allocation27_spill] sm:$0xff] %v3118_v35 }
  0x6e   : > { %2013 = vmatmul.msk.f32.vlgmr.msrb.gmra.mxu3 %vm400_vm0, %v2001_v50  ;;  %1067 = vmatpush.msra.mxu1 %v3033_v43  ;;  %v3068_v50 = vld [vmem:[%s4007_s3 + $0xb8] sm:$0xff]  ;;  %4098 = vst [vmem:[#allocation24_spill] sm:$0xff] %v3094_v40 }
  0x6f   : > { %1107 = vmatpush.msrb.mxu2 %v3042_v45  ;;  %1148 = vmatpush.msra.mxu3 %v3047_v46  ;;  %4096 = vst [vmem:[#allocation22_spill] sm:$0xff] %v3068_v50  ;;  %v3084_v45 = vld [vmem:[%s4007_s3 + $0x58] sm:$0xff] }
  0x70   : > { %1068 = vmatpush.msra.mxu1 %v3063_v49  ;;  %1043 = vmatpush.msrb.mxu0 %v3084_v45 }
  0x71   : > { %1108 = vmatpush.msrb.mxu2 %v3068_v50  ;;  %v3106_v50 = vld [vmem:[%s4007_s3 + $0x1b0] sm:$0xf] }
  0x72   : > { %1069 = vmatpush.msra.mxu1 %v3089_v41  ;;  %2067 = vmatpush.msk.msra.mxu0 %vm1024_vm1, %v3106_v50 }
  0x73   : > { %1109 = vmatpush.msrb.mxu2 %v3094_v40  ;;  %v3137_v40 = vld [vmem:[%s4007_s3 + $0x258] sm:$0xff] }
  0x74   : > { %2091 = vmatpush.msk.msrb.mxu1 %vm1024_vm1, %v3113_v36  ;;  %4104 = vst [vmem:[#allocation30_spill] sm:$0xff] %v3137_v40 }
  0x75   : > { %2093 = vmatpush.msk.msra.mxu2 %vm1024_vm1, %v3118_v35  ;;  %v3165_v35 = vld [vmem:[%s4007_s3 + $0x250] sm:$0xff] }
  0x76   : > { %2014 = vmatmul.msk.f32.gmra.mxu3 %vm400_vm0, %v2002_v51  ;;  %v3075_v51 = vld [vmem:[%s4007_s3 + $0x110] sm:$0xff]  ;;  %1230 = vmatpush.msrb.mxu1 %v3137_v40  ;;  %4108 = vst [vmem:[#allocation34_spill] sm:$0xff] %v3165_v35  ;;  %v3188_v40 = vld [vmem:[%s4007_s3 + $0x198] sm:$0xff] }
  0x77   : > { %4097 = vst [vmem:[#allocation23_spill] sm:$0xff] %v3075_v51  ;;  %1149 = vmatpush.msra.mxu3 %v3075_v51  ;;  %v3101_v51 = vld [vmem:[%s4007_s3 + $0x108] sm:$0xff]  ;;  %1253 = vmatpush.msra.mxu2 %v3142_v31 }
  0x78   : > { %4099 = vst [vmem:[#allocation25_spill] sm:$0xff] %v3101_v51  ;;  %1231 = vmatpush.msrb.mxu1 %v3165_v35  ;;  %v3193_v31 = vld [vmem:[%s4007_s3 + $0x248] sm:$0xff]  ;;  %v3205_v35 = vld [vmem:[%s4007_s3 + $0x2a0] sm:$0xff] }
  0x79   : > { %1150 = vmatpush.msra.mxu3 %v3101_v51  ;;  %v3132_v51 = vld [vmem:[%s4007_s3 + $0x1a8] sm:$0xff]  ;;  %4111 = vst [vmem:[#allocation37_spill] sm:$0xff] %v3188_v40 }
  0x7a   : > { %4103 = vst [vmem:[#allocation29_spill] sm:$0xff] %v3132_v51  ;;  %1182 = vmatpush.msra.mxu0 %v3132_v51  ;;  %1232 = vmatpush.msrb.mxu1 %v3193_v31 }
  0x7b   : > { %2106 = vmatpush.msk.msrb.mxu3 %vm1024_vm1, %v3123_v32  ;;  %v3170_v32 = vld [vmem:[%s4007_s3 + $0x1f8] sm:$0xff]  ;;  %4112 = vst [vmem:[#allocation38_spill] sm:$0xff] %v3193_v31 }
  0x7c   : > { %4109 = vst [vmem:[#allocation35_spill] sm:$0xff] %v3170_v32  ;;  %1183 = vmatpush.msra.mxu0 %v3160_v22  ;;  %1254 = vmatpush.msra.mxu2 %v3170_v32  ;;  %v3212_v22 = vld [vmem:[%s4007_s3 + $0x190] sm:$0xff]  ;;  %v3217_v32 = vld [vmem:[%s4007_s3 + $0x240] sm:$0xff]  ;;  %v3231_v31 = vld [vmem:[%s4007_s3 + $0x298] sm:$0xff] }
  0x7d   : > { %1288 = vmatpush.msrb.mxu3 %v3153_v25  ;;  %v3198_v25 = vld [vmem:[%s4007_s3 + $0x1f0] sm:$0xff]  ;;  %4114 = vst [vmem:[#allocation40_spill] sm:$0xff] %v3205_v35  ;;  %1233 = vmatpush.msrb.mxu1 %v3217_v32 }
  0x7e   : > { %4113 = vst [vmem:[#allocation39_spill] sm:$0xff] %v3198_v25  ;;  %1184 = vmatpush.msra.mxu0 %v3188_v40  ;;  %1255 = vmatpush.msra.mxu2 %v3198_v25  ;;  %v3238_v40 = vld [vmem:[%s4007_s3 + $0x188] sm:$0xff]  ;;  %v3243_v25 = vld [vmem:[%s4007_s3 + $0x238] sm:$0xff] }
  0x7f   : > { %1289 = vmatpush.msrb.mxu3 %v3181_v16  ;;  %4115 = vst [vmem:[#allocation41_spill] sm:$0xff] %v3212_v22  ;;  %v3222_v16 = vld [vmem:[%s4007_s3 + $0x1e8] sm:$0xff]  ;;  %1234 = vmatpush.msrb.mxu1 %v3243_v25 }
  0x80   : > { %4116 = vst [vmem:[#allocation42_spill] sm:$0xff] %v3217_v32  ;;  %1185 = vmatpush.msra.mxu0 %v3212_v22  ;;  %1256 = vmatpush.msra.mxu2 %v3222_v16  ;;  %v3255_v32 = vld [vmem:[%s4007_s3 + $0x290] sm:$0xff]  ;;  %v3262_v22 = vld [vmem:[%s4007_s3 + $0x180] sm:$0xff] }
  0x81   : > { %4117 = vst [vmem:[#allocation43_spill] sm:$0xff] %v3222_v16  ;;  %1290 = vmatpush.msrb.mxu3 %v3205_v35  ;;  %v3248_v35 = vld [vmem:[%s4007_s3 + $0x1e0] sm:$0xff]  ;;  %v3267_v16 = vld [vmem:[%s4007_s3 + $0x230] sm:$0xff] }
  0x82   : > { %4118 = vst [vmem:[#allocation44_spill] sm:$0xff] %v3231_v31  ;;  %1186 = vmatpush.msra.mxu0 %v3238_v40  ;;  %1257 = vmatpush.msra.mxu2 %v3248_v35 }
  0x83   : > { %4119 = vst [vmem:[#allocation45_spill] sm:$0xff] %v3238_v40  ;;  %1291 = vmatpush.msrb.mxu3 %v3231_v31  ;;  %v3272_v31 = vld [vmem:[%s4007_s3 + $0x1d8] sm:$0xff]  ;;  %1235 = vmatpush.msrb.mxu1 %v3267_v16 }
  0x84   : > { %4120 = vst [vmem:[#allocation46_spill] sm:$0xff] %v3243_v25  ;;  %v3281_v25 = vld [vmem:[%s4007_s3 + $0x288] sm:$0xff]  ;;  %1187 = vmatpush.msra.mxu0 %v3262_v22  ;;  %1258 = vmatpush.msra.mxu2 %v3272_v31 }
  0x85   : > { %4121 = vst [vmem:[#allocation47_spill] sm:$0xff] %v3248_v35  ;;  %1292 = vmatpush.msrb.mxu3 %v3255_v32  ;;  %v3292_v35 = vld [vmem:[%s4007_s3 + $0x178] sm:$0xff] }
  0x86   : > { %4122 = vst [vmem:[#allocation48_spill] sm:$0xff] %v3255_v32  ;;  %v3297_v32 = vld [vmem:[%s4007_s3 + $0x228] sm:$0xff]  ;;  %1188 = vmatpush.msra.mxu0 %v3292_v35 }
  0x87   : > { %4123 = vst [vmem:[#allocation49_spill] sm:$0xff] %v3262_v22  ;;  %1293 = vmatpush.msrb.mxu3 %v3281_v25  ;;  %v3321_v22 = vld [vmem:[%s4007_s3 + $0x220] sm:$0xff]  ;;  %1236 = vmatpush.msrb.mxu1 %v3297_v32 }
  0x88   : > { %4124 = vst [vmem:[#allocation50_spill] sm:$0xff] %v3267_v16  ;;  %v3316_v16 = vld [vmem:[%s4007_s3 + $0x170] sm:$0xff] }
  0x89   : > { %4125 = vst [vmem:[#allocation51_spill] sm:$0xff] %v3272_v31  ;;  %1189 = vmatpush.msra.mxu0 %v3316_v16  ;;  %1237 = vmatpush.msrb.mxu1 %v3321_v22 }
  0x8a   : > { %4126 = vst [vmem:[#allocation52_spill] sm:$0xff] %v3281_v25  ;;  %v3334_v25 = vld [vmem:[%s4007_s3 + $0x278] sm:$0xff] }
  0x8b   : > { %4127 = vst [vmem:[#allocation53_spill] sm:$0xff] %v3292_v35 }
  0x8c   : > { %4128 = vst [vmem:[#allocation54_spill] sm:$0xff] %v3297_v32 }
  0x8d   : > { %4131 = vst [vmem:[#allocation57_spill] sm:$0xff] %v3316_v16 }
  0x8e   : > { %4132 = vst [vmem:[#allocation58_spill] sm:$0xff] %v3321_v22 }
  0x8f   : > { %4134 = vst [vmem:[#allocation60_spill] sm:$0xff] %v3334_v25 }
  0x9c   : > { %v2787_v52 = vpop.f32.mrf.mxu0 }
  0xa0   : > { %v2789_v53 = vpop.f32.mrf.mxu3 }
  0xa1   : > { %v2791_v54 = vpop.f32.mrf.mxu2 }
  0xa5   : > { %v2793_v55 = vpop.f32.mrf.mxu0 }
  0xa7   : > { %v2799_v58 = vpop.f32.mrf.mxu1 }
  0xa9   : > { %v2795_v56 = vpop.f32.mrf.mxu3  ;;  %v2797_v57 = vpop.f32.mrf.mxu2 }
  0xad   : > { %v2801_v59 = vpop.f32.mrf.mxu0 }
  0xaf   : > { %v2809_v63 = vpop.f32.mrf.mxu1 }
  0xb1   : > { %v2803_v60 = vpop.f32.mrf.mxu3  ;;  %v2805_v61 = vpop.f32.mrf.mxu2 }
  0xb2   : > { %v630_v11 = vadd.f32 %v2805_v61, %v2799_v58  ;;  %v3302_v58 = vld [vmem:[%s4007_s3 + $0x1d0] sm:$0xff]  ;;  %v454_v61 = vadd.f32 %v2789_v53, %v2787_v52  ;;  %v3329_v53 = vld [vmem:[%s4007_s3 + $0x1c8] sm:$0xff] }
  0xb3   : > { %4129 = vst [vmem:[#allocation55_spill] sm:$0xff] %v3302_v58  ;;  %1259 = vmatpush.msra.mxu2 %v3302_v58  ;;  %v3359_v58 = vld [vmem:[%s4007_s3 + $0x270] sm:$0xff] }
  0xb4   : > { %4133 = vst [vmem:[#allocation59_spill] sm:$0xff] %v3329_v53  ;;  %v497_v32 = vadd.f32 %v2791_v54, %v454_v61  ;;  %v3380_v54 = vld [vmem:[%s4007_s3 + $0x1b8] sm:$0xff]  ;;  %v3385_v61 = vld [vmem:[%s4007_s3 + $0x268] sm:$0xff] }
  0xb5   : > { %v2807_v62 = vpop.f32.mrf.mxu0  ;;  %4136 = vst [vmem:[#allocation62_spill] sm:$0xff] %v3359_v58  ;;  %1260 = vmatpush.msra.mxu2 %v3329_v53 }
  0xb6   : > { %4138 = vst [vmem:[#allocation64_spill] sm:$0xff] %v3380_v54 }
  0xb7   : > { %v2817_v3 = vpop.f32.mrf.mxu1  ;;  %4139 = vst [vmem:[#allocation65_spill] sm:$0xff] %v3385_v61 }
  0xb9   : > { %v2811_v0 = vpop.f32.mrf.mxu3  ;;  %v2813_v1 = vpop.f32.mrf.mxu2 }
  0xbd   : > { %v2815_v2 = vpop.f32.mrf.mxu0 }
  0xbf   : > { %v2949_v28 = vpop.f32.mrf.mxu1 }
  0xc1   : > { %v2843_v8 = vpop.f32.mrf.mxu3  ;;  %v2871_v13 = vpop.f32.mrf.mxu2 }
  0xc2   : > { %v663_v52 = vadd.f32 %v2843_v8, %v630_v11  ;;  %v3341_v8 = vld [vmem:[%s4007_s3 + $0x168] sm:$0xff]  ;;  %v3346_v11 = vld [vmem:[%s4007_s3 + $0x218] sm:$0xff] }
  0xc3   : > { %1190 = vmatpush.msra.mxu0 %v3341_v8  ;;  %1238 = vmatpush.msrb.mxu1 %v3346_v11 }
  0xc4   : > { %v693_v22 = vadd.f32 %v2815_v2, %v663_v52  ;;  %v633_v2 = vadd.f32 %v2813_v1, %v2809_v63 }
  0xc5   : > { %v2897_v18 = vpop.f32.mrf.mxu0 }
  0xc6   : > { %v723_v52 = vadd.f32 %v2817_v3, %v693_v22 }
  0xc7   : > { %v3077_v46 = vpop.f32.mrf.mxu1 }
  0xc9   : > { %v2947_v27 = vpop.f32.mrf.mxu3  ;;  %v2999_v37 = vpop.f32.mrf.mxu2 }
  0xca   : > { %v664_v63 = vadd.f32 %v2947_v27, %v633_v2 }
  0xcd   : > { %v3035_v44 = vpop.f32.mrf.mxu0 }
  0xcf   : > { %v3224_v51 = vpop.f32.mrf.mxu1 }
  0xd1   : > { %v3051_v47 = vpop.f32.mrf.mxu3  ;;  %v3144_v26 = vpop.f32.mrf.mxu2 }
  0xd2   : > { %v768_v36 = vadd.f32 %v3051_v47, %v2871_v13  ;;  %v3311_v47 = vld [vmem:[%s4007_s3 + $0x280] sm:$0xff] }
  0xd3   : > { %4130 = vst [vmem:[#allocation56_spill] sm:$0xff] %v3311_v47  ;;  %1294 = vmatpush.msrb.mxu3 %v3311_v47  ;;  %v3354_v47 = vld [vmem:[%s4007_s3 + $0x1c0] sm:$0xff] }
  0xd4   : > { %v796_v31 = vadd.f32 %v3035_v44, %v768_v36  ;;  %4135 = vst [vmem:[#allocation61_spill] sm:$0xff] %v3354_v47  ;;  %v3367_v36 = vld [vmem:[%s4007_s3 + $0x160] sm:$0xff]  ;;  %v3372_v44 = vld [vmem:[%s4007_s3 + $0x210] sm:$0xff]  ;;  %1261 = vmatpush.msra.mxu2 %v3354_v47 }
  0xd5   : > { %v3174_v17 = vpop.f32.mrf.mxu0  ;;  %1295 = vmatpush.msrb.mxu3 %v3334_v25  ;;  %4137 = vst [vmem:[#allocation63_spill] sm:$0xff] %v3372_v44  ;;  %v537_v25 = vadd.f32 %v2803_v60, %v497_v32  ;;  %1191 = vmatpush.msra.mxu0 %v3367_v36  ;;  %v457_v60 = vadd.f32 %v2795_v56, %v2793_v55 }
  0xd6   : > { %1239 = vmatpush.msrb.mxu1 %v3372_v44  ;;  %1262 = vmatpush.msra.mxu2 %v3380_v54  ;;  %v694_v56 = vadd.f32 %v2897_v18, %v664_v63  ;;  %v3448_v63 = vld [vmem:[%s4007_s3 + $0x360] sm:$0xff] }
  0xd7   : > { %v923_v35 = vpop.f32.mrf.mxu1  ;;  %1296 = vmatpush.msrb.mxu3 %v3359_v58  ;;  %v498_v58 = vadd.f32 %v2797_v57, %v457_v60 }
  0xd9   : > { %v3172_v21 = vpop.f32.mrf.mxu3  ;;  %v3274_v12 = vpop.f32.mrf.mxu2  ;;  %1297 = vmatpush.msrb.mxu3 %v3385_v61  ;;  %v538_v3 = vadd.f32 %v2811_v0, %v498_v58 }
  0xdb   : > { %v578_v18 = vadd.f32 %v2807_v62, %v538_v3  ;;  %v3420_v62 = vld [vmem:[%s4007_s3 + $0x310] sm:$0xf]  ;;  %v4153_v3 = vld [vmem:[#allocation12_spill] sm:$0xff] }
  0xdd   : > { %v900_v13 = vpop.f32.mrf.mxu0 }
  0xdf   : > { %v926_v61 = vpop.f32.mrf.mxu1 }
  0xe1   : > { %v877_v40 = vpop.f32.mrf.mxu3  ;;  %v948_v32 = vpop.f32.mrf.mxu2 }
  0xe2   : > { %v901_v16 = vadd.f32 %v900_v13, %v877_v40  ;;  %v821_v40 = vadd.f32 %v3077_v46, %v796_v31  ;;  %v771_v13 = vadd.f32 %v3172_v21, %v2999_v37  ;;  %v577_v21 = vadd.f32 %v2801_v59, %v537_v25  ;;  %v2244_v59 = vld [vmem:[%s4006_s2] ss:$0 sm:$0xff] }
  0xe4   : > { %v929_v1 = vadd.f32 %v923_v35, %v901_v16  ;;  %v856_v37 = vadd.f32 %v3144_v26, %v821_v40  ;;  %v797_v46 = vadd.f32 %v3174_v17, %v771_v13  ;;  %v725_v55 = vmax.f32 %v577_v21, %v723_v52  ;;  %v3443_v52 = vld [vmem:[%s4007_s3 + $0x308] sm:$0xff]  ;;  %v3531_v21 = vld [vmem:[%s4007_s3 + $0x338] sm:$0xff] }
  0xe5   : > { %v903_v31 = vpop.f32.mrf.mxu0  ;;  %v724_v17 = vadd.f32 %v2949_v28, %v694_v56  ;;  %v4152_v56 = vld [vmem:[#allocation38_spill] sm:$0xff] }
  0xe6   : > { %v954_v54 = vadd.f32 %v948_v32, %v929_v1  ;;  %v858_v22 = vmax.f32 %v725_v55, %v856_v37  ;;  %v822_v16 = vadd.f32 %v3224_v51, %v797_v46  ;;  %v3461_v1 = vld [vmem:[%s4007_s3 + $0x300] sm:$0xff]  ;;  %v4147_v37 = vld [vmem:[#allocation33_spill] sm:$0xff] }
  0xe7   : > { %v726_v0 = vmax.f32 %v578_v18, %v724_v17  ;;  %v4150_v46 = vld [vmem:[#allocation11_spill] sm:$0xff]  ;;  %v4151_v55 = vld [vmem:[#allocation37_spill] sm:$0xff] }
  0xe8   : > { %v857_v35 = vadd.f32 %v3274_v12, %v822_v16  ;;  %v3425_v12 = vld [vmem:[%s4007_s3 + $0x368] sm:$0xf]  ;;  %v4158_v17 = vld [vmem:[#allocation15_spill] sm:$0xff] }
  0xe9   : > { %v880_v53 = vpop.f32.mrf.mxu3  ;;  %v951_v26 = vpop.f32.mrf.mxu2  ;;  %v4155_v16 = vld [vmem:[#allocation41_spill] sm:$0xff] }
  0xea   : > { %v904_v47 = vadd.f32 %v903_v31, %v880_v53  ;;  %v3466_v31 = vld [vmem:[%s4007_s3 + $0x358] sm:$0xff]  ;;  %v4162_v18 = vld [vmem:[#allocation17_spill] sm:$0xff] }
  0xec   : > { %v930_v57 = vadd.f32 %v926_v61, %v904_v47 }
  0xee   : > { %v955_v58 = vadd.f32 %v951_v26, %v930_v57  ;;  %v4159_v57 = vld [vmem:[#allocation45_spill] sm:$0xff]  ;;  %v4161_v26 = vld [vmem:[#allocation16_spill] sm:$0xff] }
  0xf1   : > { %v973_v44 = vpop.f32.mrf.mxu3 }
  0xf2   : > { %v979_v27 = vadd.f32 %v973_v44, %v954_v54  ;;  %v859_v44 = vmax.f32 %v726_v0, %v857_v35  ;;  %v4163_v35 = vld [vmem:[#allocation49_spill] sm:$0xff]  ;;  %v4165_v0 = vld [vmem:[#allocation18_spill] sm:$0xff] }
  0xf4   : > { %v981_v25 = vmax.f32 %v858_v22, %v979_v27  ;;  %v4154_v22 = vld [vmem:[#allocation13_spill] sm:$0xff]  ;;  %v4156_v27 = vld [vmem:[#allocation42_spill] sm:$0xff] }
  0xf6   : > { %v987_v53 = vadd.f32 %v2244_v59, %v981_v25  ;;  %v4160_v25 = vld [vmem:[#allocation46_spill] sm:$0xff] }
  0xf8   : > { %v989_v2 = vmax.f32 %v987_v53, 0.0  ;;  %v4164_v53 = vld [vmem:[#allocation50_spill] sm:$0xff] }
  0xf9   : > { %v976_v51 = vpop.f32.mrf.mxu3 }
  0xfa   : > { %992 = vst.msk [vmem:[#allocation2] sm:$0xff] %vm991_vm2, %v989_v2  ;;  %v980_v54 = vadd.f32 %v976_v51, %v955_v58  ;;  %v4166_v58 = vld [vmem:[#allocation19_spill] sm:$0xff]  ;;  %v4167_v2 = vld [vmem:[#allocation53_spill] sm:$0xff]  ;;  %v4168_v51 = vld [vmem:[#allocation54_spill] sm:$0xff] }
  0xfc   : > { %v982_v40 = vmax.f32 %v859_v44, %v980_v54  ;;  %v4169_v44 = vld [vmem:[#allocation20_spill] sm:$0xff]  ;;  %v4170_v54 = vld [vmem:[#allocation21_spill] sm:$0xff] }
  0xfe   : > { %v988_v13 = vadd.f32 %v2244_v59, %v982_v40  ;;  %v4157_v59 = vld [vmem:[#allocation14_spill] sm:$0xff]  ;;  %v4171_v40 = vld [vmem:[#allocation57_spill] sm:$0xff] }
 0x100   : > { %v990_v28 = vmax.f32 %v988_v13, 0.0  ;;  %v4172_v13 = vld [vmem:[#allocation58_spill] sm:$0xff] }
 0x102   : > { %994 = vst.msk [vmem:[#allocation2 + $0x8] sm:$0x3f] %vm993_vm3, %v990_v28  ;;  %v4173_v28 = vld [vmem:[#allocation22_spill] sm:$0xff] }
 0x109   : > { %v3427_v47 = vld [vmem:[#allocation2 + $0x1] ss:$2 sm:$0x1f]  ;;  %v995_v61 = vld [vmem:[#allocation2] ss:$2 sm:$0x1f] }
 0x10a   : > { %2027 = vmatmul.msk.f32.vlgmr.msrb.gmra.mxu0 %vm991_vm2, %v3427_v47  ;;  %2029 = vmatmul.msk.f32.vlgmr.msra.gmra.mxu1 %vm991_vm2, %v995_v61  ;;  %v3432_v60 = vld [vmem:[#allocation2 + $0x2] ss:$2 sm:$0x1f]  ;;  %v3434_v32 = vld [vmem:[#allocation2 + $0x3] ss:$2 sm:$0x1f] }
 0x10b   : > { %2042 = vmatmul.msk.f32.vlgmr.msrb.gmra.mxu2 %vm991_vm2, %v3432_v60  ;;  %2055 = vmatmul.msk.f32.vlgmr.msra.gmra.mxu3 %vm991_vm2, %v3434_v32 }
 0x10c   : > { %2119 = vmatpush.msk.msrb.mxu0 %vm1024_vm1, %v3420_v62  ;;  %2132 = vmatpush.msk.msra.mxu1 %vm1024_vm1, %v3425_v12 }
 0x10d   : > { %2134 = vmatpush.msk.msrb.mxu2 %vm1024_vm1, %v2822_v4  ;;  %2136 = vmatpush.msk.msra.mxu3 %vm1024_vm1, %v2827_v5  ;;  %v3475_v4 = vld [vmem:[%s4007_s3 + $0x2f8] sm:$0xff]  ;;  %v3480_v5 = vld [vmem:[%s4007_s3 + $0x350] sm:$0xff] }
 0x10e   : > { %1324 = vmatpush.msrb.mxu0 %v3443_v52  ;;  %1360 = vmatpush.msra.mxu1 %v3448_v63 }
 0x10f   : > { %1382 = vmatpush.msrb.mxu2 %v2852_v9  ;;  %1402 = vmatpush.msra.mxu3 %v2857_v10  ;;  %v3490_v9 = vld [vmem:[#allocation2 + $0x4] ss:$2 sm:$0x1f]  ;;  %v3495_v10 = vld [vmem:[%s4007_s3 + $0x2f0] sm:$0xff] }
 0x110   : > { %1325 = vmatpush.msrb.mxu0 %v3461_v1  ;;  %1361 = vmatpush.msra.mxu1 %v3466_v31 }
 0x111   : > { %1383 = vmatpush.msrb.mxu2 %v2878_v14  ;;  %1403 = vmatpush.msra.mxu3 %v2883_v15  ;;  %v3500_v14 = vld [vmem:[%s4007_s3 + $0x348] sm:$0xff] }
 0x112   : > { %1326 = vmatpush.msrb.mxu0 %v3475_v4  ;;  %1362 = vmatpush.msra.mxu1 %v3480_v5  ;;  %v3512_v15 = vld [vmem:[%s4007_s3 + $0x2e8] sm:$0xff] }
 0x113   : > { %1384 = vmatpush.msrb.mxu2 %v2904_v19  ;;  %1404 = vmatpush.msra.mxu3 %v2909_v20  ;;  %v3517_v19 = vld [vmem:[%s4007_s3 + $0x340] sm:$0xff] }
 0x114   : > { %2068 = vmatmul.msk.f32.vlgmr.msra.gmra.mxu0 %vm991_vm2, %v3490_v9  ;;  %2092 = vmatmul.msk.f32.vlgmr.msrb.gmra.mxu1 %vm991_vm2, %v3427_v47  ;;  %v3526_v20 = vld [vmem:[%s4007_s3 + $0x2e0] sm:$0xff] }
 0x115   : > { %2094 = vmatmul.msk.f32.vlgmr.msra.gmra.mxu2 %vm991_vm2, %v995_v61  ;;  %2107 = vmatmul.msk.f32.vlgmr.msrb.gmra.mxu3 %vm991_vm2, %v3432_v60  ;;  %v4174_v61 = vld [vmem:[#allocation23_spill] sm:$0xff] }
 0x116   : > { %1327 = vmatpush.msrb.mxu0 %v3495_v10  ;;  %1363 = vmatpush.msra.mxu1 %v3500_v14 }
 0x117   : > { %1385 = vmatpush.msrb.mxu2 %v2926_v23  ;;  %1405 = vmatpush.msra.mxu3 %v2931_v24  ;;  %v3540_v23 = vld [vmem:[%s4007_s3 + $0x2d8] sm:$0xff]  ;;  %v3545_v24 = vld [vmem:[%s4007_s3 + $0x330] sm:$0xff] }
 0x118   : > { %1328 = vmatpush.msrb.mxu0 %v3512_v15  ;;  %1364 = vmatpush.msra.mxu1 %v3517_v19 }
 0x119   : > { %1386 = vmatpush.msrb.mxu2 %v2956_v29  ;;  %1406 = vmatpush.msra.mxu3 %v2961_v30  ;;  %v3554_v29 = vld [vmem:[%s4007_s3 + $0x2d0] sm:$0xff]  ;;  %v3559_v30 = vld [vmem:[%s4007_s3 + $0x328] sm:$0xff] }
 0x11a   : > { %1329 = vmatpush.msrb.mxu0 %v3526_v20  ;;  %1365 = vmatpush.msra.mxu1 %v3531_v21 }
 0x11b   : > { %1387 = vmatpush.msrb.mxu2 %v2980_v33  ;;  %1407 = vmatpush.msra.mxu3 %v2985_v34  ;;  %v3568_v33 = vld [vmem:[%s4007_s3 + $0x2c8] sm:$0xff]  ;;  %v3573_v34 = vld [vmem:[%s4007_s3 + $0x320] sm:$0xff] }
 0x11c   : > { %1330 = vmatpush.msrb.mxu0 %v3540_v23  ;;  %1366 = vmatpush.msra.mxu1 %v3545_v24 }
 0x11d   : > { %1388 = vmatpush.msrb.mxu2 %v3006_v38  ;;  %1408 = vmatpush.msra.mxu3 %v3011_v39  ;;  %v3582_v38 = vld [vmem:[%s4007_s3 + $0x2c0] sm:$0xff]  ;;  %v3587_v39 = vld [vmem:[%s4007_s3 + $0x318] sm:$0xff] }
 0x11e   : > { %1331 = vmatpush.msrb.mxu0 %v3554_v29  ;;  %1367 = vmatpush.msra.mxu1 %v3559_v30 }
 0x11f   : > { %1389 = vmatpush.msrb.mxu2 %v3028_v42  ;;  %1409 = vmatpush.msra.mxu3 %v3033_v43  ;;  %v4141_v42 = vld [vmem:[#allocation6_spill] sm:$0xff]  ;;  %v4142_v43 = vld [vmem:[#allocation7_spill] sm:$0xff] }
 0x120   : > { %1332 = vmatpush.msrb.mxu0 %v3568_v33  ;;  %1368 = vmatpush.msra.mxu1 %v3573_v34 }
 0x121   : > { %1390 = vmatpush.msrb.mxu2 %v3058_v48  ;;  %1410 = vmatpush.msra.mxu3 %v3063_v49  ;;  %v4144_v48 = vld [vmem:[#allocation30_spill] sm:$0xff]  ;;  %v4145_v49 = vld [vmem:[#allocation8_spill] sm:$0xff] }
 0x122   : > { %1333 = vmatpush.msrb.mxu0 %v3582_v38  ;;  %1369 = vmatpush.msra.mxu1 %v3587_v39 }
 0x123   : > { %1391 = vmatpush.msrb.mxu2 %v3084_v45  ;;  %1411 = vmatpush.msra.mxu3 %v3089_v41  ;;  %v4140_v41 = vld [vmem:[#allocation26_spill] sm:$0xff]  ;;  %v4143_v45 = vld [vmem:[#allocation29_spill] sm:$0xff] }
 0x124   : > { %2120 = vmatmul.msk.f32.vlgmr.msrb.gmra.mxu0 %vm991_vm2, %v3434_v32  ;;  %2133 = vmatmul.msk.f32.vlgmr.msra.gmra.mxu1 %vm991_vm2, %v3490_v9 }
 0x125   : > { %2135 = vmatmul.msk.f32.vlgmr.msrb.gmra.mxu2 %vm991_vm2, %v3432_v60  ;;  %2137 = vmatmul.msk.f32.vlgmr.msra.gmra.mxu3 %vm991_vm2, %v3427_v47 }
 0x126   : > { %2138 = vmatpush.msk.msra.mxu0 %vm1024_vm1, %v2836_v6  ;;  %2140 = vmatpush.msk.msrb.mxu1 %vm1024_vm1, %v2841_v7  ;;  %v4146_v6 = vld [vmem:[#allocation9_spill] sm:$0xff]  ;;  %v4148_v7 = vld [vmem:[#allocation34_spill] sm:$0xff] }
 0x127   : > { %2142 = vmatpush.msk.msra.mxu2 %vm1024_vm1, %v3106_v50  ;;  %2144 = vmatpush.msk.msrb.mxu3 %vm1024_vm1, %v4140_v41  ;;  %v4149_v50 = vld [vmem:[#allocation10_spill] sm:$0xff]  ;;  %v4175_v41 = vld [vmem:[#allocation24_spill] sm:$0xff] }
 0x128   : > { %1422 = vmatpush.msra.mxu0 %v4141_v42  ;;  %1443 = vmatpush.msrb.mxu1 %v4142_v43  ;;  %v4176_v42 = vld [vmem:[#allocation25_spill] sm:$0xff]  ;;  %v4177_v43 = vld [vmem:[#allocation63_spill] sm:$0xff] }
 0x129   : > { %1469 = vmatpush.msra.mxu2 %v4143_v45  ;;  %1491 = vmatpush.msrb.mxu3 %v4144_v48  ;;  %v1459_v45 = vld [vmem:[#allocation2 + $0x5] ss:$2 sm:$0x1f] }
 0x12a   : > { %1423 = vmatpush.msra.mxu0 %v4145_v49  ;;  %1444 = vmatpush.msrb.mxu1 %v4146_v6  ;;  %v4181_v48 = vld [vmem:[#allocation32_spill] sm:$0xff] }
 0x12b   : > { %1470 = vmatpush.msra.mxu2 %v4147_v37  ;;  %1492 = vmatpush.msrb.mxu3 %v4148_v7  ;;  %v4183_v49 = vld [vmem:[#allocation36_spill] sm:$0xff]  ;;  %v2186_v37 = vld [vmem:[%s4009_s5 + $0x138] sm:$0xff]  ;;  %v1598_v7 = vld [vmem:[%s4009_s5 + $0x10] sm:$0xff] }
 0x12c   : > { %1424 = vmatpush.msra.mxu0 %v4149_v50  ;;  %1445 = vmatpush.msrb.mxu1 %v4150_v46  ;;  %v4185_v6 = vld [vmem:[#allocation40_spill] sm:$0xff]  ;;  %v2163_v50 = vld [vmem:[%s4009_s5 + $0x90] sm:$0xff] }
 0x12d   : > { %1471 = vmatpush.msra.mxu2 %v4151_v55  ;;  %1493 = vmatpush.msrb.mxu3 %v4152_v56  ;;  %v2174_v46 = vld [vmem:[%s4009_s5 + $0xe0] sm:$0xff]  ;;  %v2185_v55 = vld [vmem:[%s4009_s5 + $0x130] sm:$0xff] }
 0x12e   : > { %1425 = vmatpush.msra.mxu0 %v4153_v3  ;;  %1446 = vmatpush.msrb.mxu1 %v4154_v22  ;;  %v1597_v3 = vld [vmem:[%s4009_s5 + $0x8] sm:$0xff] }
 0x12f   : > { %1472 = vmatpush.msra.mxu2 %v4155_v16  ;;  %1494 = vmatpush.msrb.mxu3 %v4156_v27  ;;  %v2162_v22 = vld [vmem:[%s4009_s5 + $0x88] sm:$0xff]  ;;  %v2173_v16 = vld [vmem:[%s4009_s5 + $0xd8] sm:$0xff] }
 0x130   : > { %1426 = vmatpush.msra.mxu0 %v4157_v59  ;;  %1447 = vmatpush.msrb.mxu1 %v4158_v17  ;;  %v2184_v27 = vld [vmem:[%s4009_s5 + $0x128] sm:$0xff]  ;;  %v1596_v59 = vld [vmem:[%s4009_s5] sm:$0xff] }
 0x131   : > { %1473 = vmatpush.msra.mxu2 %v4159_v57  ;;  %1495 = vmatpush.msrb.mxu3 %v4160_v25  ;;  %v2161_v57 = vld [vmem:[%s4009_s5 + $0x80] sm:$0xff]  ;;  %v2172_v25 = vld [vmem:[%s4009_s5 + $0xd0] sm:$0xff] }
 0x132   : > { %1427 = vmatpush.msra.mxu0 %v4161_v26  ;;  %1448 = vmatpush.msrb.mxu1 %v4162_v18  ;;  %v2183_v26 = vld [vmem:[%s4009_s5 + $0x120] sm:$0xff] }
 0x133   : > { %1474 = vmatpush.msra.mxu2 %v4163_v35  ;;  %1496 = vmatpush.msrb.mxu3 %v4164_v53  ;;  %v2197_v35 = vld [vmem:[%s4009_s5 + $0x188] sm:$0xff] }
 0x134   : > { %1428 = vmatpush.msra.mxu0 %v4165_v0  ;;  %1449 = vmatpush.msrb.mxu1 %v4166_v58  ;;  %v2160_v0 = vld [vmem:[%s4009_s5 + $0x78] sm:$0xff]  ;;  %v2171_v58 = vld [vmem:[%s4009_s5 + $0xc8] sm:$0xff] }
 0x135   : > { %1475 = vmatpush.msra.mxu2 %v4167_v2  ;;  %1497 = vmatpush.msrb.mxu3 %v4168_v51  ;;  %v2182_v2 = vld [vmem:[%s4009_s5 + $0x118] sm:$0xff]  ;;  %v2196_v51 = vld [vmem:[%s4009_s5 + $0x180] sm:$0xff] }
 0x136   : > { %1429 = vmatpush.msra.mxu0 %v4169_v44  ;;  %1450 = vmatpush.msrb.mxu1 %v4170_v54  ;;  %v2159_v44 = vld [vmem:[%s4009_s5 + $0x70] sm:$0xff]  ;;  %v2170_v54 = vld [vmem:[%s4009_s5 + $0xc0] sm:$0xff] }
 0x137   : > { %1476 = vmatpush.msra.mxu2 %v4171_v40  ;;  %1498 = vmatpush.msrb.mxu3 %v4172_v13  ;;  %v2181_v40 = vld [vmem:[%s4009_s5 + $0x110] sm:$0xff]  ;;  %v2195_v13 = vld [vmem:[%s4009_s5 + $0x178] sm:$0xff] }
 0x138   : > { %1430 = vmatpush.msra.mxu0 %v4173_v28  ;;  %1451 = vmatpush.msrb.mxu1 %v4174_v61  ;;  %v2158_v28 = vld [vmem:[%s4009_s5 + $0x68] sm:$0xff]  ;;  %v2169_v61 = vld [vmem:[%s4009_s5 + $0xb8] sm:$0xff] }
 0x139   : > { %1477 = vmatpush.msra.mxu2 %v3341_v8  ;;  %1499 = vmatpush.msrb.mxu3 %v3346_v11  ;;  %v4178_v8 = vld [vmem:[#allocation27_spill] sm:$0xff]  ;;  %v4179_v11 = vld [vmem:[#allocation28_spill] sm:$0xff] }
 0x13a   : > { %1431 = vmatpush.msra.mxu0 %v4175_v41  ;;  %1452 = vmatpush.msrb.mxu1 %v4176_v42  ;;  %v2180_v42 = vld [vmem:[%s4009_s5 + $0x108] sm:$0xff] }
 0x13b   : > { %1478 = vmatpush.msra.mxu2 %v3367_v36  ;;  %1500 = vmatpush.msrb.mxu3 %v4177_v43  ;;  %v4180_v36 = vld [vmem:[#allocation31_spill] sm:$0xff]  ;;  %v2194_v43 = vld [vmem:[%s4009_s5 + $0x170] sm:$0xff] }
 0x13c   : > { %2139 = vmatmul.msk.f32.vlgmr.msra.gmra.mxu0 %vm991_vm2, %v3434_v32  ;;  %2141 = vmatmul.msk.f32.vlgmr.msrb.gmra.mxu1 %vm991_vm2, %v3490_v9 }
 0x13d   : > { %2143 = vmatmul.msk.f32.vlgmr.msra.gmra.mxu2 %vm991_vm2, %v1459_v45  ;;  %2145 = vmatmul.msk.f32.vlgmr.msrb.gmra.mxu3 %vm991_vm2, %v3432_v60  ;;  %v4182_v60 = vld [vmem:[#allocation35_spill] sm:$0xff] }
 0x13e   : > { %2146 = vmatpush.msk.msrb.mxu0 %vm1024_vm1, %v4178_v8  ;;  %2148 = vmatpush.msk.msra.mxu1 %vm1024_vm1, %v4179_v11  ;;  %v2168_v8 = vld [vmem:[%s4009_s5 + $0xb0] sm:$0xff]  ;;  %v2179_v11 = vld [vmem:[%s4009_s5 + $0x100] sm:$0xff] }
 0x13f   : > { %2150 = vmatpush.msk.msrb.mxu2 %vm1024_vm1, %v3420_v62  ;;  %2152 = vmatpush.msk.msra.mxu3 %vm1024_vm1, %v3425_v12  ;;  %v4184_v62 = vld [vmem:[#allocation39_spill] sm:$0xff] }
 0x140   : > { %1511 = vmatpush.msrb.mxu0 %v4180_v36  ;;  %1531 = vmatpush.msra.mxu1 %v4181_v48  ;;  %v4186_v12 = vld [vmem:[#allocation43_spill] sm:$0xff]  ;;  %v2193_v48 = vld [vmem:[%s4009_s5 + $0x168] sm:$0xff] }
 0x141   : > { %1552 = vmatpush.msrb.mxu2 %v3443_v52  ;;  %1573 = vmatpush.msra.mxu3 %v3448_v63  ;;  %v4187_v52 = vld [vmem:[#allocation44_spill] sm:$0xff]  ;;  %v4188_v63 = vld [vmem:[#allocation47_spill] sm:$0xff] }
 0x142   : > { %1512 = vmatpush.msrb.mxu0 %v4182_v60  ;;  %1532 = vmatpush.msra.mxu1 %v4183_v49  ;;  %v2156_v49 = vld [vmem:[%s4009_s5 + $0x58] sm:$0xff] }
 0x143   : > { %1553 = vmatpush.msrb.mxu2 %v3461_v1  ;;  %1574 = vmatpush.msra.mxu3 %v3466_v31  ;;  %v4189_v1 = vld [vmem:[#allocation48_spill] sm:$0xff]  ;;  %v4190_v31 = vld [vmem:[#allocation51_spill] sm:$0xff] }
 0x144   : > { %1513 = vmatpush.msrb.mxu0 %v4184_v62  ;;  %1533 = vmatpush.msra.mxu1 %v4185_v6  ;;  %v2167_v62 = vld [vmem:[%s4009_s5 + $0xa8] sm:$0xff]  ;;  %v2178_v6 = vld [vmem:[%s4009_s5 + $0xf8] sm:$0xff] }
 0x145   : > { %1554 = vmatpush.msrb.mxu2 %v3475_v4  ;;  %1575 = vmatpush.msra.mxu3 %v3480_v5  ;;  %v4191_v4 = vld [vmem:[#allocation52_spill] sm:$0xff]  ;;  %v4192_v5 = vld [vmem:[#allocation55_spill] sm:$0xff] }
 0x146   : > { %1514 = vmatpush.msrb.mxu0 %v4186_v12  ;;  %1534 = vmatpush.msra.mxu1 %v4187_v52  ;;  %v2192_v52 = vld [vmem:[%s4009_s5 + $0x160] sm:$0xff] }
 0x147   : > { %1555 = vmatpush.msrb.mxu2 %v3495_v10  ;;  %1576 = vmatpush.msra.mxu3 %v3500_v14  ;;  %v4193_v10 = vld [vmem:[#allocation56_spill] sm:$0xff]  ;;  %v4194_v14 = vld [vmem:[#allocation59_spill] sm:$0xff] }
 0x148   : > { %1515 = vmatpush.msrb.mxu0 %v4188_v63  ;;  %1535 = vmatpush.msra.mxu1 %v4189_v1  ;;  %v2155_v63 = vld [vmem:[%s4009_s5 + $0x50] sm:$0xff]  ;;  %v2166_v1 = vld [vmem:[%s4009_s5 + $0xa0] sm:$0xff] }
 0x149   : > { %1556 = vmatpush.msrb.mxu2 %v3512_v15  ;;  %1577 = vmatpush.msra.mxu3 %v3517_v19  ;;  %v4195_v15 = vld [vmem:[#allocation60_spill] sm:$0xff]  ;;  %v4196_v19 = vld [vmem:[#allocation61_spill] sm:$0xff] }
 0x14a   : > { %1516 = vmatpush.msrb.mxu0 %v4190_v31  ;;  %1536 = vmatpush.msra.mxu1 %v4191_v4  ;;  %v2177_v31 = vld [vmem:[%s4009_s5 + $0xf0] sm:$0xff]  ;;  %v2191_v4 = vld [vmem:[%s4009_s5 + $0x158] sm:$0xff] }
 0x14b   : > { %1557 = vmatpush.msrb.mxu2 %v3526_v20  ;;  %1578 = vmatpush.msra.mxu3 %v3531_v21  ;;  %v4197_v20 = vld [vmem:[#allocation62_spill] sm:$0xff]  ;;  %v4198_v21 = vld [vmem:[#allocation64_spill] sm:$0xff] }
 0x14c   : > { %1517 = vmatpush.msrb.mxu0 %v4192_v5  ;;  %1537 = vmatpush.msra.mxu1 %v4193_v10  ;;  %v2190_v10 = vld [vmem:[%s4009_s5 + $0x150] sm:$0xff] }
 0x14d   : > { %1558 = vmatpush.msrb.mxu2 %v3540_v23  ;;  %1579 = vmatpush.msra.mxu3 %v3545_v24  ;;  %v4199_v23 = vld [vmem:[#allocation65_spill] sm:$0xff] }
 0x14e   : > { %1518 = vmatpush.msrb.mxu0 %v4194_v14  ;;  %1538 = vmatpush.msra.mxu1 %v4195_v15  ;;  %v1605_v24 = vld [vmem:[%s4009_s5 + $0x48] sm:$0xff] }
 0x14f   : > { %1559 = vmatpush.msrb.mxu2 %v3554_v29  ;;  %1580 = vmatpush.msra.mxu3 %v3559_v30  ;;  %v1604_v29 = vld [vmem:[%s4009_s5 + $0x40] sm:$0xff]  ;;  %v2189_v14 = vld [vmem:[%s4009_s5 + $0x148] sm:$0xff] }
 0x150   : > { %1519 = vmatpush.msrb.mxu0 %v4196_v19  ;;  %1539 = vmatpush.msra.mxu1 %v4197_v20  ;;  %v1600_v30 = vld [vmem:[%s4009_s5 + $0x20] sm:$0xff] }
 0x151   : > { %1560 = vmatpush.msrb.mxu2 %v3568_v33  ;;  %1581 = vmatpush.msra.mxu3 %v3573_v34  ;;  %v1599_v33 = vld [vmem:[%s4009_s5 + $0x18] sm:$0xff]  ;;  %v2188_v19 = vld [vmem:[%s4009_s5 + $0x140] sm:$0xff] }
 0x152   : > { %1520 = vmatpush.msrb.mxu0 %v4198_v21  ;;  %1540 = vmatpush.msra.mxu1 %v4199_v23 }
 0x153   : > { %1561 = vmatpush.msrb.mxu2 %v3582_v38  ;;  %1582 = vmatpush.msra.mxu3 %v3587_v39  ;;  %v2164_v38 = vld [vmem:[%s4009_s5 + $0x98] sm:$0xff]  ;;  %v2175_v39 = vld [vmem:[%s4009_s5 + $0xe8] sm:$0xff] }
 0x154   : > { %2147 = vmatmul.msk.f32.vlgmr.msrb.gmra.mxu0 %vm991_vm2, %v3427_v47  ;;  %2149 = vmatmul.msk.f32.vlgmr.msra.gmra.mxu1 %vm991_vm2, %v3434_v32  ;;  %v1603_v47 = vld [vmem:[%s4009_s5 + $0x38] sm:$0xff]  ;;  %v1602_v32 = vld [vmem:[%s4009_s5 + $0x30] sm:$0xff] }
 0x155   : > { %2151 = vmatmul.msk.f32.vlgmr.msrb.gmra.mxu2 %vm991_vm2, %v3490_v9  ;;  %2153 = vmatmul.msk.f32.vlgmr.msra.gmra.mxu3 %vm991_vm2, %v1459_v45  ;;  %v1601_v9 = vld [vmem:[%s4009_s5 + $0x28] sm:$0xff]  ;;  %v2157_v45 = vld [vmem:[%s4009_s5 + $0x60] sm:$0xff] }
 0x156   : > { %1616 = vmatpush.msra.mxu0 %v1605_v24  ;;  %1651 = vmatpush.msrb.mxu1 %v2164_v38  ;;  %v1786_v24 = vld [vmem:[%s4011_s7 + $0x70] sm:$0xff] }
 0x157   : > { %1686 = vmatpush.msra.mxu2 %v2175_v39  ;;  %1721 = vmatpush.msrb.mxu3 %v2186_v37  ;;  %v1783_v39 = vld [vmem:[%s4011_s7 + $0x58] sm:$0xff] }
 0x158   : > { %1617 = vmatpush.msra.mxu0 %v1604_v29  ;;  %1652 = vmatpush.msrb.mxu1 %v2163_v50  ;;  %v1785_v29 = vld [vmem:[%s4011_s7 + $0x68] sm:$0xff] }
 0x159   : > { %1687 = vmatpush.msra.mxu2 %v2174_v46  ;;  %1722 = vmatpush.msrb.mxu3 %v2185_v55 }
 0x15a   : > { %1618 = vmatpush.msra.mxu0 %v1603_v47  ;;  %1653 = vmatpush.msrb.mxu1 %v2162_v22  ;;  %v1781_v22 = vld [vmem:[%s4011_s7 + $0x48] sm:$0xff] }
 0x15b   : > { %1688 = vmatpush.msra.mxu2 %v2173_v16  ;;  %1723 = vmatpush.msrb.mxu3 %v2184_v27 }
 0x15c   : > { %1619 = vmatpush.msra.mxu0 %v1602_v32  ;;  %1654 = vmatpush.msrb.mxu1 %v2161_v57  ;;  %v1784_v32 = vld [vmem:[%s4011_s7 + $0x60] sm:$0xff] }
 0x15d   : > { %1689 = vmatpush.msra.mxu2 %v2172_v25  ;;  %1724 = vmatpush.msrb.mxu3 %v2183_v26 }
 0x15e   : > { %1620 = vmatpush.msra.mxu0 %v1601_v9  ;;  %1655 = vmatpush.msrb.mxu1 %v2160_v0 }
 0x15f   : > { %1690 = vmatpush.msra.mxu2 %v2171_v58  ;;  %1725 = vmatpush.msrb.mxu3 %v2182_v2 }
 0x160   : > { %1621 = vmatpush.msra.mxu0 %v1600_v30  ;;  %1656 = vmatpush.msrb.mxu1 %v2159_v44 }
 0x161   : > { %1691 = vmatpush.msra.mxu2 %v2170_v54  ;;  %1726 = vmatpush.msrb.mxu3 %v2181_v40 }
 0x162   : > { %1622 = vmatpush.msra.mxu0 %v1599_v33  ;;  %1657 = vmatpush.msrb.mxu1 %v2158_v28 }
 0x163   : > { %1692 = vmatpush.msra.mxu2 %v2169_v61  ;;  %1727 = vmatpush.msrb.mxu3 %v2180_v42  ;;  %v1779_v42 = vld [vmem:[%s4011_s7 + $0x38] sm:$0xff] }
 0x164   : > { %1623 = vmatpush.msra.mxu0 %v1598_v7  ;;  %1658 = vmatpush.msrb.mxu1 %v2157_v45  ;;  %v1777_v45 = vld [vmem:[%s4011_s7 + $0x28] sm:$0xff] }
 0x165   : > { %1693 = vmatpush.msra.mxu2 %v2168_v8  ;;  %1728 = vmatpush.msrb.mxu3 %v2179_v11  ;;  %v1776_v8 = vld [vmem:[%s4011_s7 + $0x20] sm:$0xff]  ;;  %v1775_v11 = vld [vmem:[%s4011_s7 + $0x18] sm:$0xff] }
 0x166   : > { %1624 = vmatpush.msra.mxu0 %v1597_v3  ;;  %1659 = vmatpush.msrb.mxu1 %v2156_v49  ;;  %v1823_v49 = vld [vmem:[%s4013_s9 + $0x50] sm:$0xf] }
 0x167   : > { %1694 = vmatpush.msra.mxu2 %v2167_v62  ;;  %1729 = vmatpush.msrb.mxu3 %v2178_v6  ;;  %v1822_v62 = vld [vmem:[%s4013_s9 + $0x48] sm:$0xff]  ;;  %v1821_v6 = vld [vmem:[%s4013_s9 + $0x40] sm:$0xff] }
 0x168   : > { %1625 = vmatpush.msra.mxu0 %v1596_v59  ;;  %1660 = vmatpush.msrb.mxu1 %v2155_v63  ;;  %v1818_v63 = vld [vmem:[%s4013_s9 + $0x28] sm:$0xff] }
 0x169   : > { %1695 = vmatpush.msra.mxu2 %v2166_v1  ;;  %1730 = vmatpush.msrb.mxu3 %v2177_v31  ;;  %v1817_v1 = vld [vmem:[%s4013_s9 + $0x20] sm:$0xff]  ;;  %v1816_v31 = vld [vmem:[%s4013_s9 + $0x18] sm:$0xff] }
 0x16a   : > { %1756 = vmatpush.msrb.mxu0 %v2197_v35  ;;  %1793 = vmatpush.msra.mxu1 %v1786_v24 }
 0x16b   : > { %2200 = vmatpush.msk.msrb.mxu2 %vm1024_vm1, %v1823_v49 }
 0x16c   : > { %1757 = vmatpush.msrb.mxu0 %v2196_v51  ;;  %1794 = vmatpush.msra.mxu1 %v1785_v29  ;;  %v2245_v51 = vld [vmem:[%s4008_s4] ss:$0 sm:$0xff] }
 0x16d   : > { %1837 = vmatpush.msrb.mxu2 %v1822_v62 }
 0x16e   : > { %1758 = vmatpush.msrb.mxu0 %v2195_v13  ;;  %1795 = vmatpush.msra.mxu1 %v1784_v32  ;;  %v1815_v32 = vld [vmem:[%s4013_s9 + $0x10] sm:$0xff] }
 0x16f   : > { %1838 = vmatpush.msrb.mxu2 %v1821_v6 }
 0x170   : > { %1759 = vmatpush.msrb.mxu0 %v2194_v43  ;;  %1796 = vmatpush.msra.mxu1 %v1783_v39  ;;  %v1778_v43 = vld [vmem:[%s4011_s7 + $0x30] sm:$0xff] }
 0x172   : > { %1760 = vmatpush.msrb.mxu0 %v2193_v48  ;;  %v1773_v48 = vld [vmem:[%s4011_s7 + $0x8] sm:$0xff] }
 0x174   : > { %1761 = vmatpush.msrb.mxu0 %v2192_v52  ;;  %v1819_v52 = vld [vmem:[%s4013_s9 + $0x30] sm:$0xff] }
 0x176   : > { %1762 = vmatpush.msrb.mxu0 %v2191_v4  ;;  %v1595_v4 = vld [vmem:[%s4010_s6] sm:$0x1] }
 0x178   : > { %1763 = vmatpush.msrb.mxu0 %v2190_v10 }
 0x17a   : > { %1764 = vmatpush.msrb.mxu0 %v2189_v14 }
 0x17c   : > { %1765 = vmatpush.msrb.mxu0 %v2188_v19 }
 0x187   : > { %v3736_v34 = vpop.f32.mrf.mxu0  ;;  %v3759_v56 = vpop.f32.mrf.mxu1 }
 0x188   : > { %v1072_v47 = vadd.f32 %v3759_v56, %v3736_v34  ;;  %v1782_v34 = vld [vmem:[%s4011_s7 + $0x50] sm:$0xff] }
 0x189   : > { %1797 = vmatpush.msra.mxu1 %v1782_v34 }
 0x18b   : > { %1798 = vmatpush.msra.mxu1 %v1781_v22 }
 0x18e   : > { %v3776_v17 = vpop.f32.mrf.mxu2  ;;  %v3787_v18 = vpop.f32.mrf.mxu3 }
 0x18f   : > { %v1114_v30 = vadd.f32 %v3776_v17, %v1072_v47 }
 0x191   : > { %v3792_v53 = vpop.f32.mrf.mxu0  ;;  %v1241_v41 = vpop.f32.mrf.mxu1  ;;  %v1155_v56 = vadd.f32 %v3787_v18, %v1114_v30  ;;  %v1813_v30 = vld [vmem:[%s4013_s9] sm:$0xff] }
 0x193   : > { %v1196_v17 = vadd.f32 %v3792_v53, %v1155_v56 }
 0x198   : > { %v1264_v36 = vpop.f32.mrf.mxu2  ;;  %v1299_v12 = vpop.f32.mrf.mxu3 }
 0x199   : > { %v1265_v23 = vadd.f32 %v1264_v36, %v1241_v41  ;;  %v1780_v41 = vld [vmem:[%s4011_s7 + $0x40] sm:$0xff]  ;;  %v1774_v36 = vld [vmem:[%s4011_s7 + $0x10] sm:$0xff] }
 0x19a   : > { %1799 = vmatpush.msra.mxu1 %v1780_v41 }
 0x19b   : > { %v1302_v33 = vadd.f32 %v1299_v12, %v1265_v23  ;;  %v1820_v12 = vld [vmem:[%s4013_s9 + $0x38] sm:$0xff] }
 0x19c   : > { %1800 = vmatpush.msra.mxu1 %v1779_v42  ;;  %1839 = vmatpush.msrb.mxu2 %v1820_v12 }
 0x19e   : > { %1801 = vmatpush.msra.mxu1 %v1778_v43  ;;  %1840 = vmatpush.msrb.mxu2 %v1819_v52 }
 0x1a0   : > { %1802 = vmatpush.msra.mxu1 %v1777_v45  ;;  %1841 = vmatpush.msrb.mxu2 %v1818_v63 }
 0x1a1   : > { %v1335_v60 = vpop.f32.mrf.mxu0  ;;  %v1371_v5 = vpop.f32.mrf.mxu1 }
 0x1a2   : > { %v1338_v7 = vadd.f32 %v1335_v60, %v1302_v33  ;;  %1803 = vmatpush.msra.mxu1 %v1776_v8  ;;  %v1772_v60 = vld [vmem:[%s4011_s7] sm:$0xff]  ;;  %1842 = vmatpush.msrb.mxu2 %v1817_v1 }
 0x1a3   : > { %v1787_v33 = vld [vmem:[%s4012_s8] sm:$0x1] }
 0x1a4   : > { %v1374_v16 = vadd.f32 %v1371_v5, %v1338_v7  ;;  %1804 = vmatpush.msra.mxu1 %v1775_v11  ;;  %1843 = vmatpush.msrb.mxu2 %v1816_v31  ;;  %v1824_v7 = vld [vmem:[%s4014_s10] sm:$0x1] }
 0x1a6   : > { %v1375_v35 = vmax.f32 %v1196_v17, %v1374_v16  ;;  %1805 = vmatpush.msra.mxu1 %v1774_v36  ;;  %1844 = vmatpush.msrb.mxu2 %v1815_v32 }
 0x1a8   : > { %v1393_v15 = vpop.f32.mrf.mxu2  ;;  %v1413_v21 = vpop.f32.mrf.mxu3  ;;  %1806 = vmatpush.msra.mxu1 %v1773_v48 }
 0x1a9   : > { %v1414_v38 = vadd.f32 %v1413_v21, %v1393_v15 }
 0x1aa   : > { %1807 = vmatpush.msra.mxu1 %v1772_v60 }
 0x1b9   : > { %v1433_v20 = vpop.f32.mrf.mxu0  ;;  %v1454_v9 = vpop.f32.mrf.mxu1 }
 0x1ba   : > { %v1436_v50 = vadd.f32 %v1433_v20, %v1414_v38 }
 0x1bc   : > { %v1457_v27 = vadd.f32 %v1454_v9, %v1436_v50  ;;  %v1814_v9 = vld [vmem:[%s4013_s9 + $0x8] sm:$0xff] }
 0x1bd   : > { %1845 = vmatpush.msrb.mxu2 %v1814_v9 }
 0x1bf   : > { %1846 = vmatpush.msrb.mxu2 %v1813_v30 }
 0x1c0   : > { %v1480_v37 = vpop.f32.mrf.mxu2  ;;  %v1502_v55 = vpop.f32.mrf.mxu3 }
 0x1c1   : > { %v1483_v57 = vadd.f32 %v1480_v37, %v1457_v27 }
 0x1c3   : > { %v1484_v2 = vmax.f32 %v1375_v35, %v1483_v57 }
 0x1d1   : > { %v1522_v46 = vpop.f32.mrf.mxu0  ;;  %v1542_v59 = vpop.f32.mrf.mxu1 }
 0x1d2   : > { %v1523_v3 = vadd.f32 %v1522_v46, %v1502_v55 }
 0x1d4   : > { %v1545_v25 = vadd.f32 %v1542_v59, %v1523_v3 }
 0x1d8   : > { %v1563_v26 = vpop.f32.mrf.mxu2  ;;  %v1584_v58 = vpop.f32.mrf.mxu3 }
 0x1d9   : > { %v1566_v0 = vadd.f32 %v1563_v26, %v1545_v25 }
 0x1db   : > { %v1587_v18 = vadd.f32 %v1584_v58, %v1566_v0 }
 0x1dd   : > { %v1588_v44 = vmax.f32 %v1484_v2, %v1587_v18 }
 0x1df   : > { %v1593_v54 = vadd.f32 %v2245_v51, %v1588_v44 }
 0x1e1   : > { %v1594_v40 = vmax.f32 %v1593_v54, 0.0 }
 0x1e3   : > { %2154 = vmatmul.msk.f32.vlgmr.msra.gmra.mxu0 %vm1606_vm4, %v1594_v40  ;;  %v1642_v13 = vrot.slane %v1594_v40, 1  ;;  %v1677_v28 = vrot.slane %v1594_v40, 2  ;;  %v1712_v53 = vrot.slane %v1594_v40, 3  ;;  %v1747_v61 = vrot.slane %v1594_v40, 4 }
 0x1e5   : > { %2165 = vmatmul.msk.f32.vlgmr.msrb.gmra.mxu1 %vm1606_vm4, %v1642_v13  ;;  %2176 = vmatmul.msk.f32.vlgmr.msra.gmra.mxu2 %vm1606_vm4, %v1677_v28 }
 0x1e6   : > { %2187 = vmatmul.msk.f32.vlgmr.msrb.gmra.mxu3 %vm1606_vm4, %v1712_v53 }
 0x1eb   : > { %2198 = vmatmul.msk.f32.vlgmr.msrb.gmra.mxu0 %vm1606_vm4, %v1747_v61 }
 0x260   : > { %v1627_v5 = vpop.f32.mrf.mxu0 }
 0x261   : > { %v1630_v10 = vadd.f32 %v1627_v5, %v1595_v4 }
 0x262   : > { %v1662_v14 = vpop.f32.mrf.mxu1 }
 0x263   : > { %v1665_v15 = vadd.f32 %v1662_v14, %v1630_v10 }
 0x268   : > { %v1697_v19 = vpop.f32.mrf.mxu2  ;;  %v1767_v24 = vpop.f32.mrf.mxu0 }
 0x269   : > { %v1700_v20 = vadd.f32 %v1697_v19, %v1665_v15  ;;  %v1732_v21 = vpop.f32.mrf.mxu3 }
 0x26b   : > { %v1735_v23 = vadd.f32 %v1732_v21, %v1700_v20 }
 0x26d   : > { %v1770_v29 = vadd.f32 %v1767_v24, %v1735_v23 }
 0x26f   : > { %v1771_v47 = vmax.f32 %v1770_v29, 0.0 }
 0x271   : > { %2199 = vmatmul.msk.f32.vlgmr.msra.gmra.mxu1 %vm1788_vm5, %v1771_v47 }
 0x2ee   : > { %v1809_v38 = vpop.f32.mrf.mxu1 }
 0x2ef   : > { %v1810_v39 = vadd.f32 %v1809_v38, %v1787_v33 }
 0x2f1   : > { %v1812_v37 = vmax.f32 %v1810_v39, 0.0 }
 0x2f3   : > { %2201 = vmatmul.msk.f32.vlgmr.msrb.gmra.mxu2 %vm991_vm2, %v1812_v37 }
 0x376   : > { %v1848_v50 = vpop.f32.mrf.mxu2 }
 0x377   : > { %v1849_v46 = vadd.f32 %v1848_v50, %v1824_v7 }
 0x379   : > { %v1851_v34 = vmax.f32 %v1849_v46, 0.0 }
 0x37b   : > { %1853 = vst.msk [vmem:[%s378_s14] sm:$0x1] %vm1852_vm6, %v1851_v34 }
 0x37c   : > { %2273 = shalt.err (!%p2270_p3)
}
 0x37d   : > { %2205 = dma.vmem_to_hbm [thread:$0]  (%p2408_p5), %s1866_s24, 16, %s1868_s25, %s1855_s29  }
 0x37e PF: > { %p2211_p4 = scmp.ge.s32.totalorder %s2308_s20, 2  ;;  %s1879_s22 = sand.u32 1, %s2296_s17  }
 0x37f   : > { %s1880_s14 = scalar_lea.sflag [#allocation4], %s1879_s22 }
 0x380   : > { %p2208_p7 = pnand %p2211_p4, %p2412_p6 }
 0x382   : > { %p2209_p8 = pneg %p2208_p7 }
 0x384   : > { %2291 = dma.done.wait (%p2209_p8), %s1880_s14, 16  }
 0x385   : > { %2293 = vsyncadd (%p2209_p8), %s1880_s14, 4294967280  ;;  %p21_p9 = scmp.ge.s32.totalorder %s2395_s23, 4   ;;  %s4200_s17 = smov %s2300_s18 }
 0x386   : > { %s4201_s18 = smov %s2304_s19  ;;  %s4202_s19 = smov %s2406_s26 }
 0x387   : > { %s4203_s20 = smov %s2395_s23  ;;  %23 = sbr.rel (!%p21_p9) target bundleno = 5 (0x5), region = 137 }
 0x38c   :  { %1885 = vsyncpa [#allocation4], 1 }
 0x38d   :  { %1887 = vsyncpa [#allocation4 + $0x1], 1 }

</bundles_post_ra>
